<compile_context>
chip_gen: v7x
topology: tpu7x:2x2x1
jax: 0.10.0
libtpu: 0.0.40
codegen_flags: <defaults>
</compile_context>

<pallas_src>
import functools

import jax
import jax.numpy as jnp
from jax import lax
from jax.experimental import pallas as pl
from jax.experimental.pallas import tpu as pltpu

_IN_EPS = 1e-5      # nn.InstanceNorm2d default eps
_KSIZE = 3          # DenseBlock default kernelSize


def _round_up(x, m):
    return (x + m - 1) // m * m


def _dense_block_kernel(*refs, layers, width, hw, margin, c_total, eps):
    """Whole DenseBlock for one sample, entirely in VMEM.

    refs = (prelu_ref, x_ref, w_ref_0, ..., w_ref_{L-1}, out_ref, cats_ref)

      prelu_ref : SMEM (L,) f32                  PReLU parameter per layer
      x_ref     : VMEM (Cin0, H*W) f32           this sample's input, flattened
      w_ref_l   : VMEM (9, Coutp_l, Cinp_l) bf16 tap-major conv weights
      out_ref   : VMEM (Ctot, H*W) f32           final concat slab (lane-dense)
      cats_ref  : VMEM scratch (Ctot_pad, H*W + 2*margin) f32
                  running concat, flanked by zero margins so the shifted tap
                  slices never leave the allocation.
    """
    num_layers = len(layers)
    prelu_ref = refs[0]
    x_ref = refs[1]
    w_refs = refs[2:2 + num_layers]
    out_ref = refs[2 + num_layers]
    cats_ref = refs[3 + num_layers]

    # Zero the slab: the margins and the not-yet-written channel rows must read
    # as 0 for *this* sample (the scratch persists across grid steps).
    cats_ref[...] = jnp.zeros_like(cats_ref)

    # Drop this sample's input channels into the interior window (exact copy).
    cin0 = layers[0][0]
    cats_ref[0:cin0, margin:margin + hw] = x_ref[...]

    # Output-column index, used to mask taps whose flattened shift would wrap
    # across a row boundary ("same" padding along W).
    col = lax.broadcasted_iota(jnp.int32, (1, hw), 1) % width

    for l, (_cin, cin_p, cout, cout_p, dil, off) in enumerate(layers):
        # Conv2d as 9 shifted (Coutp, Cinp) x (Cinp, HW) MXU matmuls,
        # bf16 operands, f32 accumulation.
        acc = jnp.zeros((cout_p, hw), jnp.float32)
        for kh in range(_KSIZE):
            for kw in range(_KSIZE):
                dh = (kh - 1) * dil
                dw = (kw - 1) * dil
                delta = dh * width + dw
                tap = cats_ref[0:cin_p, margin + delta:margin + delta + hw]
                tap = tap.astype(jnp.bfloat16)
                if dw > 0:        # right neighbour: last dw output cols invalid
                    tap = jnp.where(col < width - dw, tap, jnp.zeros_like(tap))
                elif dw < 0:      # left neighbour: first |dw| output cols invalid
                    tap = jnp.where(col >= -dw, tap, jnp.zeros_like(tap))
                w_tap = w_refs[l][kh * _KSIZE + kw]        # (Coutp, Cinp) bf16
                acc = acc + jnp.dot(w_tap, tap,
                                    preferred_element_type=jnp.float32)
        # NOTE: conv bias intentionally omitted — InstanceNorm2d's per-channel
        # mean subtraction cancels a per-channel constant exactly.

        # InstanceNorm2d (affine=False): one pass of sum / sum-of-squares, f32.
        inv_hw = 1.0 / float(hw)
        mean = jnp.sum(acc, axis=-1, keepdims=True) * inv_hw
        ex2 = jnp.sum(acc * acc, axis=-1, keepdims=True) * inv_hw
        var = ex2 - mean * mean
        xhat = (acc - mean) * lax.rsqrt(var + eps)          # EUP rsqrt

        # PReLU (single shared parameter per layer, read from SMEM).
        a = prelu_ref[l]
        y = jnp.where(xhat > 0.0, xhat, a * xhat)

        # Append to the running concat at this layer's channel offset.
        cats_ref[off:off + cout, margin:margin + hw] = y[0:cout, :]

    # Single lane-dense output write for the whole block.
    out_ref[...] = cats_ref[0:c_total, margin:margin + hw]


def dense_block_forward(x, conv_weights, prelu_params, dilations, *, eps=_IN_EPS):
    """DenseBlock forward.  x: (N, Cin, H, W) f32, conv_weights[l]: (Cout_l, Cin_l, 3, 3)."""
    n, cin0, h, w = x.shape
    hw = h * w
    num_layers = len(conv_weights)
    assert len(dilations) == num_layers

    d_max = max(int(d) for d in dilations)
    # Zero margin on the flattened spatial axis; rounded to a lane multiple so
    # interior stores stay lane-aligned (tap reads are unaligned by nature).
    margin = _round_up(d_max * (w + 1), 128)

    layers = []
    packed_w = []
    c = cin0
    for wgt, d in zip(conv_weights, dilations):
        cout, cin, kh, kw = wgt.shape
        assert cin == c and kh == _KSIZE and kw == _KSIZE
        cin_p, cout_p = _round_up(cin, 8), _round_up(cout, 8)
        layers.append((cin, cin_p, cout, cout_p, int(d), c))
        # Tap-major (kh*3+kw, Coutp, Cinp), zero-padded, bf16 MXU operands.
        wt = jnp.transpose(wgt, (2, 3, 0, 1)).reshape(_KSIZE * _KSIZE, cout, cin)
        wt = jnp.pad(wt, ((0, 0), (0, cout_p - cout), (0, cin_p - cin)))
        packed_w.append(wt.astype(jnp.bfloat16))
        c += cout
    c_total = c
    c_total_p = _round_up(c_total, 8)

    prelu_arr = jnp.asarray(prelu_params, jnp.float32).reshape((num_layers,))
    x_flat = x.reshape(n, cin0, hw).astype(jnp.float32)

    kernel = functools.partial(
        _dense_block_kernel, layers=tuple(layers), width=w, hw=hw,
        margin=margin, c_total=c_total, eps=eps)

    flops = 2 * n * hw * sum(9 * ci_p * co_p for (_, ci_p, _, co_p, _, _) in layers)
    transcendentals = n * sum(co for (_, _, co, _, _, _) in layers)
    bytes_accessed = (x_flat.size * 4 + sum(pw.size * 2 for pw in packed_w)
                      + n * c_total * hw * 4)

    in_specs = [
        pl.BlockSpec(memory_space=pltpu.MemorySpace.SMEM),         # PReLU params
        pl.BlockSpec((None, cin0, hw), lambda i: (i, 0, 0)),       # x, per sample
    ]
    in_specs += [pl.BlockSpec(pw.shape, lambda i: (0, 0, 0)) for pw in packed_w]

    out = pl.pallas_call(
        kernel,
        out_shape=jax.ShapeDtypeStruct((n, c_total, hw), jnp.float32),
        grid=(n,),
        in_specs=in_specs,
        out_specs=pl.BlockSpec((None, c_total, hw), lambda i: (i, 0, 0)),
        scratch_shapes=[pltpu.VMEM((c_total_p, hw + 2 * margin), jnp.float32)],
        compiler_params=pltpu.CompilerParams(
            dimension_semantics=("parallel",)),
        cost_estimate=pl.CostEstimate(flops=flops,
                                      transcendentals=transcendentals,
                                      bytes_accessed=bytes_accessed),
    )(prelu_arr, x_flat, *packed_w)

    return out.reshape(n, c_total, h, w)


def init_dense_block_params(key, in_channels, channels, kernel_size=_KSIZE):
    """Deterministic parameters matching DenseBlock's layer structure."""
    weights, biases, prelu = [], [], []
    cin = in_channels
    for ch in channels:
        key, k_w, k_b, k_a = jax.random.split(key, 4)
        fan_in = cin * kernel_size * kernel_size
        weights.append(jax.random.normal(
            k_w, (ch, cin, kernel_size, kernel_size), jnp.float32)
            / jnp.sqrt(float(fan_in)))
        biases.append(0.1 * jax.random.normal(k_b, (ch,), jnp.float32))
        prelu.append(0.25 + 0.05 * jax.random.uniform(k_a, (), jnp.float32))
        cin += ch
    return weights, biases, jnp.stack(prelu)


def _reference_dense_block(x, conv_weights, conv_biases, prelu_params, dilations,
                           *, matmul_dtype=jnp.float32, eps=_IN_EPS):
    """Pure-JAX reference (lax conv + bias + InstanceNorm + PReLU).

    With matmul_dtype=bfloat16 the conv operands are rounded like the kernel's
    MXU operands (accumulation stays f32) -> matched-precision check.
    """
    cats = x
    for wgt, b, a, d in zip(conv_weights, conv_biases, prelu_params, dilations):
        pad = ((wgt.shape[2] - 1) // 2) * d
        y = lax.conv_general_dilated(
            cats.astype(matmul_dtype), wgt.astype(matmul_dtype),
            window_strides=(1, 1), padding=[(pad, pad), (pad, pad)],
            rhs_dilation=(d, d),
            dimension_numbers=("NCHW", "OIHW", "NCHW"),
            preferred_element_type=jnp.float32,
            precision=(lax.Precision.HIGHEST if matmul_dtype == jnp.float32
                       else lax.Precision.DEFAULT),
        )
        y = y + b.reshape(1, -1, 1, 1)   # kernel omits this: cancelled by IN
        mean = jnp.mean(y, axis=(2, 3), keepdims=True)
        var = jnp.mean((y - mean) ** 2, axis=(2, 3), keepdims=True)
        y = (y - mean) * lax.rsqrt(var + eps)
        y = jnp.where(y > 0.0, y, a * y)
        cats = jnp.concatenate([cats, y], axis=1)
    return cats


if __name__ == "__main__":
    key = jax.random.PRNGKey(0)
    key, kx = jax.random.split(key)

    # DenseBlock(inChannels=4, channels=[4, 4], dilations=[1, 2]) on 16x16 maps.
    N, CIN, H, W = 2, 4, 16, 16
    channels = [4, 4]
    dilations = (1, 2)

    x = jax.random.normal(kx, (N, CIN, H, W), jnp.float32)
    weights, biases, prelu = init_dense_block_params(key, CIN, channels)

    fwd = jax.jit(functools.partial(dense_block_forward, dilations=dilations))
    out = jax.block_until_ready(fwd(x, weights, prelu))

    c_total = CIN + sum(channels)
    assert out.shape == (N, c_total, H, W), out.shape
    assert out.dtype == jnp.float32

    # 1) the pass-through channels of the concat are an exact copy of x.
    assert jnp.array_equal(out[:, :CIN], x), "input pass-through is not exact"

    # 2) matched-precision reference (bf16 conv operands, f32 accumulation;
    #    bias included -> also demonstrates the bias cancels under InstanceNorm).
    ref_bf16 = _reference_dense_block(x, weights, biases, prelu, dilations,
                                      matmul_dtype=jnp.bfloat16)
    err_m = float(jnp.max(jnp.abs(out - ref_bf16)))
    assert jnp.allclose(out, ref_bf16, atol=5e-3, rtol=5e-3), (
        f"mismatch vs matched-precision reference: max abs err = {err_m}")

    # 3) loose sanity check vs the all-f32 HIGHEST reference (difference is the
    #    expected bf16 operand rounding of the MXU matmuls).
    ref_f32 = _reference_dense_block(x, weights, biases, prelu, dilations,
                                     matmul_dtype=jnp.float32)
    err_f = float(jnp.max(jnp.abs(out - ref_f32)))
    assert jnp.allclose(out, ref_f32, atol=6e-2, rtol=6e-2), (
        f"mismatch vs f32 reference: max abs err = {err_f}")

    print("KERNEL_OK")
</pallas_src>

<mosaic_0001>
module attributes {stable_mosaic.version = 11 : i64} {
  func.func @_dense_block_kernel(%arg0: i32, %arg1: memref<2xf32, #tpu.memory_space<smem>>, %arg2: memref<1x4x256xf32, #tpu.memory_space<vmem>>, %arg3: memref<9x8x8xbf16, #tpu.memory_space<vmem>>, %arg4: memref<9x8x8xbf16, #tpu.memory_space<vmem>>, %arg5: memref<1x12x256xf32, #tpu.memory_space<vmem>>, %arg6: memref<16x512xf32, #tpu.memory_space<vmem>>) attributes {dimension_semantics = [#tpu.dimension_semantics<parallel>], iteration_bounds = array<i64: 2>, scalar_prefetch = 0 : i64, scratch_operands = 1 : i64, tpu.core_type = #tpu.core_type<tc>, window_params = [{transform_indices = @transform_0, window_bounds = array<i64: 2>}, {transform_indices = @transform_1, window_bounds = array<i64: 1, 4, 256>}, {pipeline_mode = #tpu.pipeline_mode<synchronous>, transform_indices = @transform_2, window_bounds = array<i64: 9, 8, 8>}, {pipeline_mode = #tpu.pipeline_mode<synchronous>, transform_indices = @transform_3, window_bounds = array<i64: 9, 8, 8>}, {transform_indices = @transform_4, window_bounds = array<i64: 1, 12, 256>}]} {
    %cst = arith.constant 0.000000e+00 : f32
    %0 = vector.broadcast %cst : f32 to vector<16x512xf32>
    %c0 = arith.constant 0 : index
    %c0_0 = arith.constant 0 : index
    %1 = vector.load %arg6[%c0, %c0_0] : memref<16x512xf32, #tpu.memory_space<vmem>>, vector<16x512xf32>
    tpu.vector_store %arg6[%c0, %c0_0], %0 {strides = array<i32>} : memref<16x512xf32, #tpu.memory_space<vmem>>, vector<16x512xf32>,
    %c0_1 = arith.constant 0 : index
    %c0_2 = arith.constant 0 : index
    %c0_3 = arith.constant 0 : index
    %2 = vector.load %arg2[%c0_1, %c0_2, %c0_3] : memref<1x4x256xf32, #tpu.memory_space<vmem>>, vector<1x4x256xf32>
    %3 = vector.shape_cast %2 : vector<1x4x256xf32> to vector<4x256xf32>
    %c0_4 = arith.constant 0 : index
    %c128 = arith.constant 128 : index
    %4 = vector.load %arg6[%c0_4, %c128] : memref<16x512xf32, #tpu.memory_space<vmem>>, vector<4x256xf32>
    tpu.vector_store %arg6[%c0_4, %c128], %3 {strides = array<i32>} : memref<16x512xf32, #tpu.memory_space<vmem>>, vector<4x256xf32>,
    %5 = tpu.iota {dimensions = array<i32: 1>} : vector<1x256xi32>
    %c16_i32 = arith.constant 16 : i32
    %c0_i32 = arith.constant 0 : i32
    %6 = arith.cmpi eq, %c16_i32, %c0_i32 : i32
    %c1_i32 = arith.constant 1 : i32
    %7 = arith.select %6, %c1_i32, %c16_i32 : i32
    %8 = vector.broadcast %7 : i32 to vector<1x256xi32>
    %9 = arith.remsi %5, %8 : vector<1x256xi32>
    %c0_i32_5 = arith.constant 0 : i32
    %10 = vector.broadcast %c0_i32_5 : i32 to vector<1x256xi32>
    %11 = arith.cmpi ne, %9, %10 : vector<1x256xi32>
    %c0_i32_6 = arith.constant 0 : i32
    %12 = vector.broadcast %c0_i32_6 : i32 to vector<1x256xi32>
    %13 = arith.cmpi slt, %9, %12 : vector<1x256xi32>
    %c0_i32_7 = arith.constant 0 : i32
    %14 = arith.cmpi slt, %7, %c0_i32_7 : i32
    %15 = vector.broadcast %14 : i1 to vector<1x256xi1>
    %16 = vector.broadcast %15 : vector<1x256xi1> to vector<1x256xi1>
    %17 = arith.xori %13, %16 : vector<1x256xi1>
    %18 = arith.andi %17, %11 : vector<1x256xi1>
    %19 = vector.broadcast %7 : i32 to vector<1x256xi32>
    %20 = arith.addi %9, %19 : vector<1x256xi32>
    %21 = arith.select %18, %20, %9 : vector<1x256xi1>, vector<1x256xi32>
    %cst_8 = arith.constant 0.000000e+00 : f32
    %22 = vector.broadcast %cst_8 : f32 to vector<8x256xf32>
    %c0_9 = arith.constant 0 : index
    %c111 = arith.constant 111 : index
    %23 = vector.load %arg6[%c0_9, %c111] : memref<16x512xf32, #tpu.memory_space<vmem>>, vector<8x256xf32>
    %24 = arith.truncf %23 : vector<8x256xf32> to vector<8x256xbf16>
    %c1_i32_10 = arith.constant 1 : i32
    %25 = vector.broadcast %c1_i32_10 : i32 to vector<1x256xi32>
    %26 = arith.cmpi sge, %21, %25 : vector<1x256xi32>
    %cst_11 = arith.constant 0.000000e+00 : bf16
    %27 = vector.broadcast %cst_11 : bf16 to vector<8x256xbf16>
    %28 = vector.shape_cast %26 : vector<1x256xi1> to vector<1x256xi1>
    %29 = vector.broadcast %28 : vector<1x256xi1> to vector<8x256xi1>
    %30 = arith.select %29, %24, %27 : vector<8x256xi1>, vector<8x256xbf16>
    %c0_12 = arith.constant 0 : index
    %c0_13 = arith.constant 0 : index
    %c0_14 = arith.constant 0 : index
    %31 = vector.load %arg3[%c0_12, %c0_13, %c0_14] : memref<9x8x8xbf16, #tpu.memory_space<vmem>>, vector<1x8x8xbf16>
    %32 = vector.shape_cast %31 : vector<1x8x8xbf16> to vector<8x8xbf16>
    %cst_15 = arith.constant dense<0.000000e+00> : vector<8x256xf32>
    %33 = tpu.matmul %32, %30, %cst_15 {dimension_numbers = #tpu.dot_dimension_numbers<[1], [0], [0], [1], [0, 0, 1, 1], [], []>} : vector<8x8xbf16>, vector<8x256xbf16>, vector<8x256xf32> -> vector<8x256xf32>
    %34 = arith.addf %22, %33 : vector<8x256xf32>
    %c0_16 = arith.constant 0 : index
    %c112 = arith.constant 112 : index
    %35 = vector.load %arg6[%c0_16, %c112] : memref<16x512xf32, #tpu.memory_space<vmem>>, vector<8x256xf32>
    %36 = arith.truncf %35 : vector<8x256xf32> to vector<8x256xbf16>
    %c1 = arith.constant 1 : index
    %c0_17 = arith.constant 0 : index
    %c0_18 = arith.constant 0 : index
    %37 = vector.load %arg3[%c1, %c0_17, %c0_18] : memref<9x8x8xbf16, #tpu.memory_space<vmem>>, vector<1x8x8xbf16>
    %38 = vector.shape_cast %37 : vector<1x8x8xbf16> to vector<8x8xbf16>
    %cst_19 = arith.constant dense<0.000000e+00> : vector<8x256xf32>
    %39 = tpu.matmul %38, %36, %cst_19 {dimension_numbers = #tpu.dot_dimension_numbers<[1], [0], [0], [1], [0, 0, 1, 1], [], []>} : vector<8x8xbf16>, vector<8x256xbf16>, vector<8x256xf32> -> vector<8x256xf32>
    %40 = arith.addf %34, %39 : vector<8x256xf32>
    %c0_20 = arith.constant 0 : index
    %c113 = arith.constant 113 : index
    %41 = vector.load %arg6[%c0_20, %c113] : memref<16x512xf32, #tpu.memory_space<vmem>>, vector<8x256xf32>
    %42 = arith.truncf %41 : vector<8x256xf32> to vector<8x256xbf16>
    %c15_i32 = arith.constant 15 : i32
    %43 = vector.broadcast %c15_i32 : i32 to vector<1x256xi32>
    %44 = arith.cmpi slt, %21, %43 : vector<1x256xi32>
    %cst_21 = arith.constant 0.000000e+00 : bf16
    %45 = vector.broadcast %cst_21 : bf16 to vector<8x256xbf16>
    %46 = vector.shape_cast %44 : vector<1x256xi1> to vector<1x256xi1>
    %47 = vector.broadcast %46 : vector<1x256xi1> to vector<8x256xi1>
    %48 = arith.select %47, %42, %45 : vector<8x256xi1>, vector<8x256xbf16>
    %c2 = arith.constant 2 : index
    %c0_22 = arith.constant 0 : index
    %c0_23 = arith.constant 0 : index
    %49 = vector.load %arg3[%c2, %c0_22, %c0_23] : memref<9x8x8xbf16, #tpu.memory_space<vmem>>, vector<1x8x8xbf16>
    %50 = vector.shape_cast %49 : vector<1x8x8xbf16> to vector<8x8xbf16>
    %cst_24 = arith.constant dense<0.000000e+00> : vector<8x256xf32>
    %51 = tpu.matmul %50, %48, %cst_24 {dimension_numbers = #tpu.dot_dimension_numbers<[1], [0], [0], [1], [0, 0, 1, 1], [], []>} : vector<8x8xbf16>, vector<8x256xbf16>, vector<8x256xf32> -> vector<8x256xf32>
    %52 = arith.addf %40, %51 : vector<8x256xf32>
    %c0_25 = arith.constant 0 : index
    %c127 = arith.constant 127 : index
    %53 = vector.load %arg6[%c0_25, %c127] : memref<16x512xf32, #tpu.memory_space<vmem>>, vector<8x256xf32>
    %54 = arith.truncf %53 : vector<8x256xf32> to vector<8x256xbf16>
    %c1_i32_26 = arith.constant 1 : i32
    %55 = vector.broadcast %c1_i32_26 : i32 to vector<1x256xi32>
    %56 = arith.cmpi sge, %21, %55 : vector<1x256xi32>
    %cst_27 = arith.constant 0.000000e+00 : bf16
    %57 = vector.broadcast %cst_27 : bf16 to vector<8x256xbf16>
    %58 = vector.shape_cast %56 : vector<1x256xi1> to vector<1x256xi1>
    %59 = vector.broadcast %58 : vector<1x256xi1> to vector<8x256xi1>
    %60 = arith.select %59, %54, %57 : vector<8x256xi1>, vector<8x256xbf16>
    %c3 = arith.constant 3 : index
    %c0_28 = arith.constant 0 : index
    %c0_29 = arith.constant 0 : index
    %61 = vector.load %arg3[%c3, %c0_28, %c0_29] : memref<9x8x8xbf16, #tpu.memory_space<vmem>>, vector<1x8x8xbf16>
    %62 = vector.shape_cast %61 : vector<1x8x8xbf16> to vector<8x8xbf16>
    %cst_30 = arith.constant dense<0.000000e+00> : vector<8x256xf32>
    %63 = tpu.matmul %62, %60, %cst_30 {dimension_numbers = #tpu.dot_dimension_numbers<[1], [0], [0], [1], [0, 0, 1, 1], [], []>} : vector<8x8xbf16>, vector<8x256xbf16>, vector<8x256xf32> -> vector<8x256xf32>
    %64 = arith.addf %52, %63 : vector<8x256xf32>
    %c0_31 = arith.constant 0 : index
    %c128_32 = arith.constant 128 : index
    %65 = vector.load %arg6[%c0_31, %c128_32] : memref<16x512xf32, #tpu.memory_space<vmem>>, vector<8x256xf32>
    %66 = arith.truncf %65 : vector<8x256xf32> to vector<8x256xbf16>
    %c4 = arith.constant 4 : index
    %c0_33 = arith.constant 0 : index
    %c0_34 = arith.constant 0 : index
    %67 = vector.load %arg3[%c4, %c0_33, %c0_34] : memref<9x8x8xbf16, #tpu.memory_space<vmem>>, vector<1x8x8xbf16>
    %68 = vector.shape_cast %67 : vector<1x8x8xbf16> to vector<8x8xbf16>
    %cst_35 = arith.constant dense<0.000000e+00> : vector<8x256xf32>
    %69 = tpu.matmul %68, %66, %cst_35 {dimension_numbers = #tpu.dot_dimension_numbers<[1], [0], [0], [1], [0, 0, 1, 1], [], []>} : vector<8x8xbf16>, vector<8x256xbf16>, vector<8x256xf32> -> vector<8x256xf32>
    %70 = arith.addf %64, %69 : vector<8x256xf32>
    %c0_36 = arith.constant 0 : index
    %c129 = arith.constant 129 : index
    %71 = vector.load %arg6[%c0_36, %c129] : memref<16x512xf32, #tpu.memory_space<vmem>>, vector<8x256xf32>
    %72 = arith.truncf %71 : vector<8x256xf32> to vector<8x256xbf16>
    %c15_i32_37 = arith.constant 15 : i32
    %73 = vector.broadcast %c15_i32_37 : i32 to vector<1x256xi32>
    %74 = arith.cmpi slt, %21, %73 : vector<1x256xi32>
    %cst_38 = arith.constant 0.000000e+00 : bf16
    %75 = vector.broadcast %cst_38 : bf16 to vector<8x256xbf16>
    %76 = vector.shape_cast %74 : vector<1x256xi1> to vector<1x256xi1>
    %77 = vector.broadcast %76 : vector<1x256xi1> to vector<8x256xi1>
    %78 = arith.select %77, %72, %75 : vector<8x256xi1>, vector<8x256xbf16>
    %c5 = arith.constant 5 : index
    %c0_39 = arith.constant 0 : index
    %c0_40 = arith.constant 0 : index
    %79 = vector.load %arg3[%c5, %c0_39, %c0_40] : memref<9x8x8xbf16, #tpu.memory_space<vmem>>, vector<1x8x8xbf16>
    %80 = vector.shape_cast %79 : vector<1x8x8xbf16> to vector<8x8xbf16>
    %cst_41 = arith.constant dense<0.000000e+00> : vector<8x256xf32>
    %81 = tpu.matmul %80, %78, %cst_41 {dimension_numbers = #tpu.dot_dimension_numbers<[1], [0], [0], [1], [0, 0, 1, 1], [], []>} : vector<8x8xbf16>, vector<8x256xbf16>, vector<8x256xf32> -> vector<8x256xf32>
    %82 = arith.addf %70, %81 : vector<8x256xf32>
    %c0_42 = arith.constant 0 : index
    %c143 = arith.constant 143 : index
    %83 = vector.load %arg6[%c0_42, %c143] : memref<16x512xf32, #tpu.memory_space<vmem>>, vector<8x256xf32>
    %84 = arith.truncf %83 : vector<8x256xf32> to vector<8x256xbf16>
    %c1_i32_43 = arith.constant 1 : i32
    %85 = vector.broadcast %c1_i32_43 : i32 to vector<1x256xi32>
    %86 = arith.cmpi sge, %21, %85 : vector<1x256xi32>
    %cst_44 = arith.constant 0.000000e+00 : bf16
    %87 = vector.broadcast %cst_44 : bf16 to vector<8x256xbf16>
    %88 = vector.shape_cast %86 : vector<1x256xi1> to vector<1x256xi1>
    %89 = vector.broadcast %88 : vector<1x256xi1> to vector<8x256xi1>
    %90 = arith.select %89, %84, %87 : vector<8x256xi1>, vector<8x256xbf16>
    %c6 = arith.constant 6 : index
    %c0_45 = arith.constant 0 : index
    %c0_46 = arith.constant 0 : index
    %91 = vector.load %arg3[%c6, %c0_45, %c0_46] : memref<9x8x8xbf16, #tpu.memory_space<vmem>>, vector<1x8x8xbf16>
    %92 = vector.shape_cast %91 : vector<1x8x8xbf16> to vector<8x8xbf16>
    %cst_47 = arith.constant dense<0.000000e+00> : vector<8x256xf32>
    %93 = tpu.matmul %92, %90, %cst_47 {dimension_numbers = #tpu.dot_dimension_numbers<[1], [0], [0], [1], [0, 0, 1, 1], [], []>} : vector<8x8xbf16>, vector<8x256xbf16>, vector<8x256xf32> -> vector<8x256xf32>
    %94 = arith.addf %82, %93 : vector<8x256xf32>
    %c0_48 = arith.constant 0 : index
    %c144 = arith.constant 144 : index
    %95 = vector.load %arg6[%c0_48, %c144] : memref<16x512xf32, #tpu.memory_space<vmem>>, vector<8x256xf32>
    %96 = arith.truncf %95 : vector<8x256xf32> to vector<8x256xbf16>
    %c7 = arith.constant 7 : index
    %c0_49 = arith.constant 0 : index
    %c0_50 = arith.constant 0 : index
    %97 = vector.load %arg3[%c7, %c0_49, %c0_50] : memref<9x8x8xbf16, #tpu.memory_space<vmem>>, vector<1x8x8xbf16>
    %98 = vector.shape_cast %97 : vector<1x8x8xbf16> to vector<8x8xbf16>
    %cst_51 = arith.constant dense<0.000000e+00> : vector<8x256xf32>
    %99 = tpu.matmul %98, %96, %cst_51 {dimension_numbers = #tpu.dot_dimension_numbers<[1], [0], [0], [1], [0, 0, 1, 1], [], []>} : vector<8x8xbf16>, vector<8x256xbf16>, vector<8x256xf32> -> vector<8x256xf32>
    %100 = arith.addf %94, %99 : vector<8x256xf32>
    %c0_52 = arith.constant 0 : index
    %c145 = arith.constant 145 : index
    %101 = vector.load %arg6[%c0_52, %c145] : memref<16x512xf32, #tpu.memory_space<vmem>>, vector<8x256xf32>
    %102 = arith.truncf %101 : vector<8x256xf32> to vector<8x256xbf16>
    %c15_i32_53 = arith.constant 15 : i32
    %103 = vector.broadcast %c15_i32_53 : i32 to vector<1x256xi32>
    %104 = arith.cmpi slt, %21, %103 : vector<1x256xi32>
    %cst_54 = arith.constant 0.000000e+00 : bf16
    %105 = vector.broadcast %cst_54 : bf16 to vector<8x256xbf16>
    %106 = vector.shape_cast %104 : vector<1x256xi1> to vector<1x256xi1>
    %107 = vector.broadcast %106 : vector<1x256xi1> to vector<8x256xi1>
    %108 = arith.select %107, %102, %105 : vector<8x256xi1>, vector<8x256xbf16>
    %c8 = arith.constant 8 : index
    %c0_55 = arith.constant 0 : index
    %c0_56 = arith.constant 0 : index
    %109 = vector.load %arg3[%c8, %c0_55, %c0_56] : memref<9x8x8xbf16, #tpu.memory_space<vmem>>, vector<1x8x8xbf16>
    %110 = vector.shape_cast %109 : vector<1x8x8xbf16> to vector<8x8xbf16>
    %cst_57 = arith.constant dense<0.000000e+00> : vector<8x256xf32>
    %111 = tpu.matmul %110, %108, %cst_57 {dimension_numbers = #tpu.dot_dimension_numbers<[1], [0], [0], [1], [0, 0, 1, 1], [], []>} : vector<8x8xbf16>, vector<8x256xbf16>, vector<8x256xf32> -> vector<8x256xf32>
    %112 = arith.addf %100, %111 : vector<8x256xf32>
    %cst_58 = arith.constant dense<0.000000e+00> : vector<8xf32>
    %113 = vector.multi_reduction <add>, %112, %cst_58 [1] : vector<8x256xf32> to vector<8xf32>
    %114 = vector.shape_cast %113 : vector<8xf32> to vector<8x1xf32>
    %cst_59 = arith.constant 3.906250e-03 : f32
    %115 = vector.broadcast %cst_59 : f32 to vector<8x1xf32>
    %116 = arith.mulf %114, %115 : vector<8x1xf32>
    %117 = arith.mulf %112, %112 : vector<8x256xf32>
    %cst_60 = arith.constant dense<0.000000e+00> : vector<8xf32>
    %118 = vector.multi_reduction <add>, %117, %cst_60 [1] : vector<8x256xf32> to vector<8xf32>
    %119 = vector.shape_cast %118 : vector<8xf32> to vector<8x1xf32>
    %cst_61 = arith.constant 3.906250e-03 : f32
    %120 = vector.broadcast %cst_61 : f32 to vector<8x1xf32>
    %121 = arith.mulf %119, %120 : vector<8x1xf32>
    %122 = arith.mulf %116, %116 : vector<8x1xf32>
    %123 = arith.subf %121, %122 : vector<8x1xf32>
    %124 = vector.broadcast %116 : vector<8x1xf32> to vector<8x256xf32>
    %125 = arith.subf %112, %124 : vector<8x256xf32>
    %cst_62 = arith.constant 9.99999974E-6 : f32
    %126 = vector.broadcast %cst_62 : f32 to vector<8x1xf32>
    %127 = arith.addf %123, %126 : vector<8x1xf32>
    %128 = math.rsqrt %127 : vector<8x1xf32>
    %129 = vector.broadcast %128 : vector<8x1xf32> to vector<8x256xf32>
    %130 = arith.mulf %125, %129 : vector<8x256xf32>
    %c0_63 = arith.constant 0 : index
    %131 = memref.load %arg1[%c0_63] : memref<2xf32, #tpu.memory_space<smem>>
    %cst_64 = arith.constant 0.000000e+00 : f32
    %132 = vector.broadcast %cst_64 : f32 to vector<8x256xf32>
    %133 = arith.cmpf ogt, %130, %132 : vector<8x256xf32>
    %134 = vector.broadcast %131 : f32 to vector<8x256xf32>
    %135 = arith.mulf %134, %130 : vector<8x256xf32>
    %136 = arith.select %133, %130, %135 : vector<8x256xi1>, vector<8x256xf32>
    %137 = vector.extract_strided_slice %136 {offsets = [0, 0], sizes = [4, 256], strides = [1, 1]} : vector<8x256xf32> to vector<4x256xf32>
    %c4_65 = arith.constant 4 : index
    %c128_66 = arith.constant 128 : index
    %138 = vector.load %arg6[%c4_65, %c128_66] : memref<16x512xf32, #tpu.memory_space<vmem>>, vector<4x256xf32>
    tpu.vector_store %arg6[%c4_65, %c128_66], %137 {strides = array<i32>} : memref<16x512xf32, #tpu.memory_space<vmem>>, vector<4x256xf32>,
    %cst_67 = arith.constant 0.000000e+00 : f32
    %139 = vector.broadcast %cst_67 : f32 to vector<8x256xf32>
    %c0_68 = arith.constant 0 : index
    %c94 = arith.constant 94 : index
    %140 = vector.load %arg6[%c0_68, %c94] : memref<16x512xf32, #tpu.memory_space<vmem>>, vector<8x256xf32>
    %141 = arith.truncf %140 : vector<8x256xf32> to vector<8x256xbf16>
    %c2_i32 = arith.constant 2 : i32
    %142 = vector.broadcast %c2_i32 : i32 to vector<1x256xi32>
    %143 = arith.cmpi sge, %21, %142 : vector<1x256xi32>
    %cst_69 = arith.constant 0.000000e+00 : bf16
    %144 = vector.broadcast %cst_69 : bf16 to vector<8x256xbf16>
    %145 = vector.shape_cast %143 : vector<1x256xi1> to vector<1x256xi1>
    %146 = vector.broadcast %145 : vector<1x256xi1> to vector<8x256xi1>
    %147 = arith.select %146, %141, %144 : vector<8x256xi1>, vector<8x256xbf16>
    %c0_70 = arith.constant 0 : index
    %c0_71 = arith.constant 0 : index
    %c0_72 = arith.constant 0 : index
    %148 = vector.load %arg4[%c0_70, %c0_71, %c0_72] : memref<9x8x8xbf16, #tpu.memory_space<vmem>>, vector<1x8x8xbf16>
    %149 = vector.shape_cast %148 : vector<1x8x8xbf16> to vector<8x8xbf16>
    %cst_73 = arith.constant dense<0.000000e+00> : vector<8x256xf32>
    %150 = tpu.matmul %149, %147, %cst_73 {dimension_numbers = #tpu.dot_dimension_numbers<[1], [0], [0], [1], [0, 0, 1, 1], [], []>} : vector<8x8xbf16>, vector<8x256xbf16>, vector<8x256xf32> -> vector<8x256xf32>
    %151 = arith.addf %139, %150 : vector<8x256xf32>
    %c0_74 = arith.constant 0 : index
    %c96 = arith.constant 96 : index
    %152 = vector.load %arg6[%c0_74, %c96] : memref<16x512xf32, #tpu.memory_space<vmem>>, vector<8x256xf32>
    %153 = arith.truncf %152 : vector<8x256xf32> to vector<8x256xbf16>
    %c1_75 = arith.constant 1 : index
    %c0_76 = arith.constant 0 : index
    %c0_77 = arith.constant 0 : index
    %154 = vector.load %arg4[%c1_75, %c0_76, %c0_77] : memref<9x8x8xbf16, #tpu.memory_space<vmem>>, vector<1x8x8xbf16>
    %155 = vector.shape_cast %154 : vector<1x8x8xbf16> to vector<8x8xbf16>
    %cst_78 = arith.constant dense<0.000000e+00> : vector<8x256xf32>
    %156 = tpu.matmul %155, %153, %cst_78 {dimension_numbers = #tpu.dot_dimension_numbers<[1], [0], [0], [1], [0, 0, 1, 1], [], []>} : vector<8x8xbf16>, vector<8x256xbf16>, vector<8x256xf32> -> vector<8x256xf32>
    %157 = arith.addf %151, %156 : vector<8x256xf32>
    %c0_79 = arith.constant 0 : index
    %c98 = arith.constant 98 : index
    %158 = vector.load %arg6[%c0_79, %c98] : memref<16x512xf32, #tpu.memory_space<vmem>>, vector<8x256xf32>
    %159 = arith.truncf %158 : vector<8x256xf32> to vector<8x256xbf16>
    %c14_i32 = arith.constant 14 : i32
    %160 = vector.broadcast %c14_i32 : i32 to vector<1x256xi32>
    %161 = arith.cmpi slt, %21, %160 : vector<1x256xi32>
    %cst_80 = arith.constant 0.000000e+00 : bf16
    %162 = vector.broadcast %cst_80 : bf16 to vector<8x256xbf16>
    %163 = vector.shape_cast %161 : vector<1x256xi1> to vector<1x256xi1>
    %164 = vector.broadcast %163 : vector<1x256xi1> to vector<8x256xi1>
    %165 = arith.select %164, %159, %162 : vector<8x256xi1>, vector<8x256xbf16>
    %c2_81 = arith.constant 2 : index
    %c0_82 = arith.constant 0 : index
    %c0_83 = arith.constant 0 : index
    %166 = vector.load %arg4[%c2_81, %c0_82, %c0_83] : memref<9x8x8xbf16, #tpu.memory_space<vmem>>, vector<1x8x8xbf16>
    %167 = vector.shape_cast %166 : vector<1x8x8xbf16> to vector<8x8xbf16>
    %cst_84 = arith.constant dense<0.000000e+00> : vector<8x256xf32>
    %168 = tpu.matmul %167, %165, %cst_84 {dimension_numbers = #tpu.dot_dimension_numbers<[1], [0], [0], [1], [0, 0, 1, 1], [], []>} : vector<8x8xbf16>, vector<8x256xbf16>, vector<8x256xf32> -> vector<8x256xf32>
    %169 = arith.addf %157, %168 : vector<8x256xf32>
    %c0_85 = arith.constant 0 : index
    %c126 = arith.constant 126 : index
    %170 = vector.load %arg6[%c0_85, %c126] : memref<16x512xf32, #tpu.memory_space<vmem>>, vector<8x256xf32>
    %171 = arith.truncf %170 : vector<8x256xf32> to vector<8x256xbf16>
    %c2_i32_86 = arith.constant 2 : i32
    %172 = vector.broadcast %c2_i32_86 : i32 to vector<1x256xi32>
    %173 = arith.cmpi sge, %21, %172 : vector<1x256xi32>
    %cst_87 = arith.constant 0.000000e+00 : bf16
    %174 = vector.broadcast %cst_87 : bf16 to vector<8x256xbf16>
    %175 = vector.shape_cast %173 : vector<1x256xi1> to vector<1x256xi1>
    %176 = vector.broadcast %175 : vector<1x256xi1> to vector<8x256xi1>
    %177 = arith.select %176, %171, %174 : vector<8x256xi1>, vector<8x256xbf16>
    %c3_88 = arith.constant 3 : index
    %c0_89 = arith.constant 0 : index
    %c0_90 = arith.constant 0 : index
    %178 = vector.load %arg4[%c3_88, %c0_89, %c0_90] : memref<9x8x8xbf16, #tpu.memory_space<vmem>>, vector<1x8x8xbf16>
    %179 = vector.shape_cast %178 : vector<1x8x8xbf16> to vector<8x8xbf16>
    %cst_91 = arith.constant dense<0.000000e+00> : vector<8x256xf32>
    %180 = tpu.matmul %179, %177, %cst_91 {dimension_numbers = #tpu.dot_dimension_numbers<[1], [0], [0], [1], [0, 0, 1, 1], [], []>} : vector<8x8xbf16>, vector<8x256xbf16>, vector<8x256xf32> -> vector<8x256xf32>
    %181 = arith.addf %169, %180 : vector<8x256xf32>
    %c0_92 = arith.constant 0 : index
    %c128_93 = arith.constant 128 : index
    %182 = vector.load %arg6[%c0_92, %c128_93] : memref<16x512xf32, #tpu.memory_space<vmem>>, vector<8x256xf32>
    %183 = arith.truncf %182 : vector<8x256xf32> to vector<8x256xbf16>
    %c4_94 = arith.constant 4 : index
    %c0_95 = arith.constant 0 : index
    %c0_96 = arith.constant 0 : index
    %184 = vector.load %arg4[%c4_94, %c0_95, %c0_96] : memref<9x8x8xbf16, #tpu.memory_space<vmem>>, vector<1x8x8xbf16>
    %185 = vector.shape_cast %184 : vector<1x8x8xbf16> to vector<8x8xbf16>
    %cst_97 = arith.constant dense<0.000000e+00> : vector<8x256xf32>
    %186 = tpu.matmul %185, %183, %cst_97 {dimension_numbers = #tpu.dot_dimension_numbers<[1], [0], [0], [1], [0, 0, 1, 1], [], []>} : vector<8x8xbf16>, vector<8x256xbf16>, vector<8x256xf32> -> vector<8x256xf32>
    %187 = arith.addf %181, %186 : vector<8x256xf32>
    %c0_98 = arith.constant 0 : index
    %c130 = arith.constant 130 : index
    %188 = vector.load %arg6[%c0_98, %c130] : memref<16x512xf32, #tpu.memory_space<vmem>>, vector<8x256xf32>
    %189 = arith.truncf %188 : vector<8x256xf32> to vector<8x256xbf16>
    %c14_i32_99 = arith.constant 14 : i32
    %190 = vector.broadcast %c14_i32_99 : i32 to vector<1x256xi32>
    %191 = arith.cmpi slt, %21, %190 : vector<1x256xi32>
    %cst_100 = arith.constant 0.000000e+00 : bf16
    %192 = vector.broadcast %cst_100 : bf16 to vector<8x256xbf16>
    %193 = vector.shape_cast %191 : vector<1x256xi1> to vector<1x256xi1>
    %194 = vector.broadcast %193 : vector<1x256xi1> to vector<8x256xi1>
    %195 = arith.select %194, %189, %192 : vector<8x256xi1>, vector<8x256xbf16>
    %c5_101 = arith.constant 5 : index
    %c0_102 = arith.constant 0 : index
    %c0_103 = arith.constant 0 : index
    %196 = vector.load %arg4[%c5_101, %c0_102, %c0_103] : memref<9x8x8xbf16, #tpu.memory_space<vmem>>, vector<1x8x8xbf16>
    %197 = vector.shape_cast %196 : vector<1x8x8xbf16> to vector<8x8xbf16>
    %cst_104 = arith.constant dense<0.000000e+00> : vector<8x256xf32>
    %198 = tpu.matmul %197, %195, %cst_104 {dimension_numbers = #tpu.dot_dimension_numbers<[1], [0], [0], [1], [0, 0, 1, 1], [], []>} : vector<8x8xbf16>, vector<8x256xbf16>, vector<8x256xf32> -> vector<8x256xf32>
    %199 = arith.addf %187, %198 : vector<8x256xf32>
    %c0_105 = arith.constant 0 : index
    %c158 = arith.constant 158 : index
    %200 = vector.load %arg6[%c0_105, %c158] : memref<16x512xf32, #tpu.memory_space<vmem>>, vector<8x256xf32>
    %201 = arith.truncf %200 : vector<8x256xf32> to vector<8x256xbf16>
    %c2_i32_106 = arith.constant 2 : i32
    %202 = vector.broadcast %c2_i32_106 : i32 to vector<1x256xi32>
    %203 = arith.cmpi sge, %21, %202 : vector<1x256xi32>
    %cst_107 = arith.constant 0.000000e+00 : bf16
    %204 = vector.broadcast %cst_107 : bf16 to vector<8x256xbf16>
    %205 = vector.shape_cast %203 : vector<1x256xi1> to vector<1x256xi1>
    %206 = vector.broadcast %205 : vector<1x256xi1> to vector<8x256xi1>
    %207 = arith.select %206, %201, %204 : vector<8x256xi1>, vector<8x256xbf16>
    %c6_108 = arith.constant 6 : index
    %c0_109 = arith.constant 0 : index
    %c0_110 = arith.constant 0 : index
    %208 = vector.load %arg4[%c6_108, %c0_109, %c0_110] : memref<9x8x8xbf16, #tpu.memory_space<vmem>>, vector<1x8x8xbf16>
    %209 = vector.shape_cast %208 : vector<1x8x8xbf16> to vector<8x8xbf16>
    %cst_111 = arith.constant dense<0.000000e+00> : vector<8x256xf32>
    %210 = tpu.matmul %209, %207, %cst_111 {dimension_numbers = #tpu.dot_dimension_numbers<[1], [0], [0], [1], [0, 0, 1, 1], [], []>} : vector<8x8xbf16>, vector<8x256xbf16>, vector<8x256xf32> -> vector<8x256xf32>
    %211 = arith.addf %199, %210 : vector<8x256xf32>
    %c0_112 = arith.constant 0 : index
    %c160 = arith.constant 160 : index
    %212 = vector.load %arg6[%c0_112, %c160] : memref<16x512xf32, #tpu.memory_space<vmem>>, vector<8x256xf32>
    %213 = arith.truncf %212 : vector<8x256xf32> to vector<8x256xbf16>
    %c7_113 = arith.constant 7 : index
    %c0_114 = arith.constant 0 : index
    %c0_115 = arith.constant 0 : index
    %214 = vector.load %arg4[%c7_113, %c0_114, %c0_115] : memref<9x8x8xbf16, #tpu.memory_space<vmem>>, vector<1x8x8xbf16>
    %215 = vector.shape_cast %214 : vector<1x8x8xbf16> to vector<8x8xbf16>
    %cst_116 = arith.constant dense<0.000000e+00> : vector<8x256xf32>
    %216 = tpu.matmul %215, %213, %cst_116 {dimension_numbers = #tpu.dot_dimension_numbers<[1], [0], [0], [1], [0, 0, 1, 1], [], []>} : vector<8x8xbf16>, vector<8x256xbf16>, vector<8x256xf32> -> vector<8x256xf32>
    %217 = arith.addf %211, %216 : vector<8x256xf32>
    %c0_117 = arith.constant 0 : index
    %c162 = arith.constant 162 : index
    %218 = vector.load %arg6[%c0_117, %c162] : memref<16x512xf32, #tpu.memory_space<vmem>>, vector<8x256xf32>
    %219 = arith.truncf %218 : vector<8x256xf32> to vector<8x256xbf16>
    %c14_i32_118 = arith.constant 14 : i32
    %220 = vector.broadcast %c14_i32_118 : i32 to vector<1x256xi32>
    %221 = arith.cmpi slt, %21, %220 : vector<1x256xi32>
    %cst_119 = arith.constant 0.000000e+00 : bf16
    %222 = vector.broadcast %cst_119 : bf16 to vector<8x256xbf16>
    %223 = vector.shape_cast %221 : vector<1x256xi1> to vector<1x256xi1>
    %224 = vector.broadcast %223 : vector<1x256xi1> to vector<8x256xi1>
    %225 = arith.select %224, %219, %222 : vector<8x256xi1>, vector<8x256xbf16>
    %c8_120 = arith.constant 8 : index
    %c0_121 = arith.constant 0 : index
    %c0_122 = arith.constant 0 : index
    %226 = vector.load %arg4[%c8_120, %c0_121, %c0_122] : memref<9x8x8xbf16, #tpu.memory_space<vmem>>, vector<1x8x8xbf16>
    %227 = vector.shape_cast %226 : vector<1x8x8xbf16> to vector<8x8xbf16>
    %cst_123 = arith.constant dense<0.000000e+00> : vector<8x256xf32>
    %228 = tpu.matmul %227, %225, %cst_123 {dimension_numbers = #tpu.dot_dimension_numbers<[1], [0], [0], [1], [0, 0, 1, 1], [], []>} : vector<8x8xbf16>, vector<8x256xbf16>, vector<8x256xf32> -> vector<8x256xf32>
    %229 = arith.addf %217, %228 : vector<8x256xf32>
    %cst_124 = arith.constant dense<0.000000e+00> : vector<8xf32>
    %230 = vector.multi_reduction <add>, %229, %cst_124 [1] : vector<8x256xf32> to vector<8xf32>
    %231 = vector.shape_cast %230 : vector<8xf32> to vector<8x1xf32>
    %cst_125 = arith.constant 3.906250e-03 : f32
    %232 = vector.broadcast %cst_125 : f32 to vector<8x1xf32>
    %233 = arith.mulf %231, %232 : vector<8x1xf32>
    %234 = arith.mulf %229, %229 : vector<8x256xf32>
    %cst_126 = arith.constant dense<0.000000e+00> : vector<8xf32>
    %235 = vector.multi_reduction <add>, %234, %cst_126 [1] : vector<8x256xf32> to vector<8xf32>
    %236 = vector.shape_cast %235 : vector<8xf32> to vector<8x1xf32>
    %cst_127 = arith.constant 3.906250e-03 : f32
    %237 = vector.broadcast %cst_127 : f32 to vector<8x1xf32>
    %238 = arith.mulf %236, %237 : vector<8x1xf32>
    %239 = arith.mulf %233, %233 : vector<8x1xf32>
    %240 = arith.subf %238, %239 : vector<8x1xf32>
    %241 = vector.broadcast %233 : vector<8x1xf32> to vector<8x256xf32>
    %242 = arith.subf %229, %241 : vector<8x256xf32>
    %cst_128 = arith.constant 9.99999974E-6 : f32
    %243 = vector.broadcast %cst_128 : f32 to vector<8x1xf32>
    %244 = arith.addf %240, %243 : vector<8x1xf32>
    %245 = math.rsqrt %244 : vector<8x1xf32>
    %246 = vector.broadcast %245 : vector<8x1xf32> to vector<8x256xf32>
    %247 = arith.mulf %242, %246 : vector<8x256xf32>
    %c1_129 = arith.constant 1 : index
    %248 = memref.load %arg1[%c1_129] : memref<2xf32, #tpu.memory_space<smem>>
    %cst_130 = arith.constant 0.000000e+00 : f32
    %249 = vector.broadcast %cst_130 : f32 to vector<8x256xf32>
    %250 = arith.cmpf ogt, %247, %249 : vector<8x256xf32>
    %251 = vector.broadcast %248 : f32 to vector<8x256xf32>
    %252 = arith.mulf %251, %247 : vector<8x256xf32>
    %253 = arith.select %250, %247, %252 : vector<8x256xi1>, vector<8x256xf32>
    %254 = vector.extract_strided_slice %253 {offsets = [0, 0], sizes = [4, 256], strides = [1, 1]} : vector<8x256xf32> to vector<4x256xf32>
    %c8_131 = arith.constant 8 : index
    %c128_132 = arith.constant 128 : index
    %255 = vector.load %arg6[%c8_131, %c128_132] : memref<16x512xf32, #tpu.memory_space<vmem>>, vector<4x256xf32>
    tpu.vector_store %arg6[%c8_131, %c128_132], %254 {strides = array<i32>} : memref<16x512xf32, #tpu.memory_space<vmem>>, vector<4x256xf32>,
    %c0_133 = arith.constant 0 : index
    %c128_134 = arith.constant 128 : index
    %256 = vector.load %arg6[%c0_133, %c128_134] : memref<16x512xf32, #tpu.memory_space<vmem>>, vector<12x256xf32>
    %c0_135 = arith.constant 0 : index
    %c0_136 = arith.constant 0 : index
    %c0_137 = arith.constant 0 : index
    %257 = vector.load %arg5[%c0_135, %c0_136, %c0_137] : memref<1x12x256xf32, #tpu.memory_space<vmem>>, vector<1x12x256xf32>
    %258 = vector.shape_cast %257 : vector<1x12x256xf32> to vector<12x256xf32>
    %259 = vector.shape_cast %256 : vector<12x256xf32> to vector<1x12x256xf32>
    tpu.vector_store %arg5[%c0_135, %c0_136, %c0_137], %259 {strides = array<i32>} : memref<1x12x256xf32, #tpu.memory_space<vmem>>, vector<1x12x256xf32>,
    return
  }
  func.func @transform_0(%arg0: i32) -> i32 {
    %c0_i32 = arith.constant 0 : i32
    %c0_i32_0 = arith.constant 0 : i32
    return %c0_i32 : i32
  }
  func.func @transform_1(%arg0: i32) -> (i32, i32, i32) {
    %c0_i32 = arith.constant 0 : i32
    %c0_i32_0 = arith.constant 0 : i32
    %c0_i32_1 = arith.constant 0 : i32
    return %arg0, %c0_i32, %c0_i32_0 : i32, i32, i32
  }
  func.func @transform_2(%arg0: i32) -> (i32, i32, i32) {
    %c0_i32 = arith.constant 0 : i32
    %c0_i32_0 = arith.constant 0 : i32
    %c0_i32_1 = arith.constant 0 : i32
    %c0_i32_2 = arith.constant 0 : i32
    return %c0_i32, %c0_i32_0, %c0_i32_1 : i32, i32, i32
  }
  func.func @transform_3(%arg0: i32) -> (i32, i32, i32) {
    %c0_i32 = arith.constant 0 : i32
    %c0_i32_0 = arith.constant 0 : i32
    %c0_i32_1 = arith.constant 0 : i32
    %c0_i32_2 = arith.constant 0 : i32
    return %c0_i32, %c0_i32_0, %c0_i32_1 : i32, i32, i32
  }
  func.func @transform_4(%arg0: i32) -> (i32, i32, i32) {
    %c0_i32 = arith.constant 0 : i32
    %c0_i32_0 = arith.constant 0 : i32
    %c0_i32_1 = arith.constant 0 : i32
    return %arg0, %c0_i32, %c0_i32_0 : i32, i32, i32
  }
}

</mosaic_0001>

<bundles_post_ra>
// kernel: dense_block_forward.1
= control target key start
LH: loop header
LB: loop body
LE: loop exit
PB: predicated region body
PF: predicated region fallthrough
CT: control target
= control target key end

     0   :  { %9 = vsyncpa [#allocation4], 0  ;;  %s2015_s15 = smov 0   ;;  %s2379_s0 = inlined_call_operand.vmem [shape: f32[2], index: 0, kind: input, shape index: {}]   ;;  %s2380_s1 = inlined_call_operand.vmem [shape: f32[2,4,256], index: 1, kind: input, shape index: {}]   ;;  %s2381_s2 = inlined_call_operand.vmem [shape: bf16[9,8,8], index: 2, kind: input, shape index: {}]   ;;  %s2382_s3 = inlined_call_operand.vmem [shape: bf16[9,8,8], index: 3, kind: input, shape index: {}]   ;;  %s2383_s4 = inlined_call_operand.vmem [shape: f32[2,12,256], index: 4, kind: output, shape index: {}]  }
   0x1 LB: > { %s2021_s16 = sadd.s32 4294967295, %s1968_s15   ;;  %p1771_p0 = scmp.ge.s32.totalorder %s1968_s15, 1  ;;  %s1968_s15 = sphi %s2015_s15, %s15_s15  }
   0x2   : > { %p135_p1 = scmp.lt.s32.totalorder %s1968_s15, 3  ;;  %s148_s19 = sshll.u32 %s2379_s0, 4  ;;  %s149_s19 = int_to_ptr.vmem [resolvable:$true] %s148_s19 }
   0x3   : > { %p1909_p3 = scmp.eq.s32.totalorder %s2021_s16, 0  ;;  %s1943_s21 = scalar_lea.vmem %s149_s19, 16 }
   0x4   : > { %p2028_p2 = pnand %p1771_p0, %p135_p1  ;;  %p1944_p6 = scmp.ne.s32.totalorder %s149_s19, %s1943_s21 }
   0x5   : > { %p1951_p10 = scmp.lt.s32.totalorder %s149_s19, %s149_s19  ;;  %p1952_p11 = scmp.lt.s32.totalorder %s1943_s21, %s1943_s21 }
   0x6   : > { %p1905_p4 = pneg %p2028_p2 }
   0x7   : > { %p1953_p12 = por %p1952_p11, %p1951_p10 }
   0x8   : > { %p1906_p5 = pnand %p1909_p3, %p1905_p4 }
   0xa   : > { %p1945_p7 = pneg %p1906_p5 }
   0xc   : > { %p1946_p8 = pnand %p1945_p7, %p1944_p6 }
   0xe   : > { %p1947_p9 = pneg %p1946_p8 }
  0x10   : > { %p1954_p13 = pnand %p1953_p12, %p1947_p9 }
  0x12   : > { %1957 = shalt.err (!%p1954_p13)
}
  0x13   : > { %s1970_s22 = smov [#allocation3]   ;;  %175 = sbr.rel (%p2028_p2) target bundleno = 1466 (0x5ba), region = 36 }
  0x14   : > { %1908 = dma.vmem_to_smem (!%p1906_p5), %s149_s19, 16, %s1970_s22, [#allocation4]  }
  0x1a   : > { %1963 = dma.done.wait (%p1909_p3), [#allocation4], 16  }
  0x1b   : > { %1965 = vsyncadd (%p1909_p3), [#allocation4], 4294967280 }
  0x1c   : > { %181 = sfence }
  0x1d   : > { %v229_v0 = vlaneseq  ;;  %v1971_v1 = vmov 0.0   ;;  %v1972_v2 = vmov 0   ;;  %p202_p0 = scmp.lt.s32.totalorder %s2021_s16, 1  ;;  %s1973_s27 = smov 111   ;;  %v1977_v21 = vmov 0.0|0.0  }
  0x1e   : > { %216 = vst [vmem:[#allocation2 + $0x8] sm:$0xff] %v1971_v1  ;;  %217 = vst [vmem:[#allocation2 + $0x10] sm:$0xff] %v1971_v1  ;;  %348 = vmatprep.mubr.bf16.mxu0 %v1972_v2  ;;  %1069 = vmatprep.mubr.bf16.mxu1 %v1972_v2  ;;  %s1974_s28 = smov 113   ;;  %s1975_s29 = smov 127   ;;  %vm282_vm6 = vcmask 908288   ;;  %vm439_vm7 = vcmask 924672  }
  0x1f   : > { %220 = vst [vmem:[#allocation2 + $0x28] sm:$0xff] %v1971_v1  ;;  %221 = vst [vmem:[#allocation2 + $0x30] sm:$0xff] %v1971_v1  ;;  %v230_v3 = vand.u32 127, %v229_v0  ;;  %v271_v4 = vshrl.u32 %v229_v0, 7  ;;  %s2386_s16 = smov (!%p202_p0, %s2021_s16), 1  ;;  %s1976_s30 = smov 1  }
  0x20   : > { %s1835_s23 = sshll.u32 %s2386_s16, 3  ;;  %s1978_s5 = smov 16   ;;  %vm517_vm12 = vcmask 1039360   ;;  %vm536_vm13 = vcmask 7168   ;;  %vm302_vm14 = vcmask 130048  }
  0x21   : > { %v231_v5 = vadd.s32 128, %v230_v3  ;;  %v2046_v6 = vand.u32 15, %v230_v3  ;;  %v2055_v8 = vsub.s32 0, %v271_v4  ;;  %s206_s26 = scalar_lea.vmem %s2380_s1, %s1835_s23  ;;  %v2063_v10 = vsub.s32 4, %v271_v4  ;;  %s1979_s6 = smov 15  }
  0x22   : > { %v223_v9 = vld [vmem:[%s206_s26] sm:$0xff]  ;;  %s1980_s7 = smov 17   ;;  %s1981_s10 = smov 112  }
  0x23   : > { %v2051_v7 = vand.u32 15, %v231_v5  ;;  %vm262_vm0 = vcmp.ge.s32.totalorder %v2046_v6, 1  ;;  %vm419_vm1 = vcmp.lt.s32.totalorder %v2046_v6, 15  ;;  %227 = vst [vmem:[#allocation2 + $0x8] sm:$0xf] %v223_v9  ;;  %v225_v11 = vcombine.high %v223_v9, %v223_v9  ;;  %s963_s8 = sld [smem:[#allocation3]] }
  0x24   : > { %v1780_v48 = vld [vmem:[%s2381_s2 + $0x4] sm:$0xf]  ;;  %v290_v62 = vld [vmem:[%s2381_s2] sm:$0xf]  ;;  %s1836_s9 = sshll.u32 %s2386_s16, 5  ;;  %s1987_s16 = smov 30  }
  0x25   : > { %vm263_vm2 = vcmp.ge.s32.totalorder %v2051_v7, 1  ;;  %vm420_vm3 = vcmp.lt.s32.totalorder %v2051_v7, 15  ;;  %228 = vst [vmem:[#allocation2 + $0x10] sm:$0xf] %v225_v11  ;;  %s2245_s12 = scalar_lea.vmem %s2383_s4, %s1836_s9  ;;  %s1988_s13 = smov 34  }
  0x26   : > { %vm268_vm4 = vmpackc.low %vm263_vm2, %vm262_vm0  ;;  %vm309_vm0 = vcmask 1043456   ;;  %s1989_s18 = smov 96   ;;  %s1832_s9 = sld [smem:[#allocation3 + $0x1]] }
  0x27   : > { %v269_v12 = vsel %vm268_vm4, 65537, %v1972_v2  ;;  %vm425_vm5 = vmpackc.low %vm420_vm3, %vm419_vm1  ;;  %vm305_vm4 = vcmask 64512  }
  0x28   : > { %v273_v13 = vrot.slane %v269_v12, %v2055_v8  ;;  %v426_v14 = vsel %vm425_vm5, 65537, %v1972_v2  ;;  %v277_v16 = vrot.slane %v269_v12, %v2063_v10  ;;  %vm458_vm5 = vcmask 121856  }
  0x29   : > { %v430_v15 = vrot.slane %v426_v14, %v2055_v8  ;;  %v434_v17 = vrot.slane %v426_v14, %v2063_v10 }
  0x2a   : > { %278 = vrot.lane.b32.xlu0 %v273_v13, %s1973_s27  ;;  %v257_v18 = vld [vmem:[#allocation2 + $0x8] sm:$0xff] }
  0x2b   : > { %435 = vrot.lane.b32.xlu1 %v430_v15, %s1974_s28  ;;  %v2079_v19 = vpack.c.bf16 %v257_v18, %v257_v18 }
  0x2c   : > { %v258_v20 = vld [vmem:[#allocation2 + $0x10] sm:$0xff] }
  0x2d   : > { %v2082_v22 = vpack.c.bf16 %v258_v20, %v258_v20 }
  0x2e   : > { %280 = vrot.lane.b32.xlu0 %v277_v16, %s1973_s27 }
  0x2f   : > { %437 = vrot.lane.b32.xlu1 %v434_v17, %s1974_s28 }
  0x32   : > { %513 = vrot.lane.b32.xlu0 %v273_v13, %s1975_s29 }
  0x33   : > { %515 = vrot.lane.b32.xlu1 %v277_v16, %s1975_s29 }
  0x36   : > { %651 = vrot.lane.b32.xlu0 %v430_v15, %s1976_s30 }
  0x37   : > { %653 = vrot.lane.b32.xlu1 %v434_v17, %s1976_s30 }
  0x3a   : > { %296 = vrot.lane.b32.xlu0 %v1977_v21, %s1978_s5 }
  0x3b   : > { %298 = vrot.lane.b32.xlu1 %v2079_v19, %s1978_s5 }
  0x3e   : > { %300 = vrot.lane.b32.xlu0 %v2082_v22, %s1978_s5  ;;  %s1984_s5 = smov 126  }
  0x3f   : > { %727 = vrot.lane.b32.xlu1 %v273_v13, %s1979_s6 }
  0x42   : > { %729 = vrot.lane.b32.xlu0 %v277_v16, %s1979_s6 }
  0x43   : > { %360 = vrot.lane.b32.xlu1 %v1977_v21, %s1980_s7 }
  0x9c   : > { %v279_v23 = vpop.permute.xlu0 %278 }
  0x9d   : > { %v436_v24 = vpop.permute.xlu1 %435 }
  0xa0   : > { %v281_v25 = vpop.permute.xlu0 %280 }
  0xa1   : > { %v283_v26 = vsel %vm282_vm6, %v279_v23, %v281_v25  ;;  %vm286_vm8 = vcmp.ne.s16.totalorder %v281_v25, 0  ;;  %v438_v27 = vpop.permute.xlu1 %437 }
  0xa2   : > { %vm285_vm9 = vcmp.ne.s16.totalorder %v283_v26, 0  ;;  %v440_v28 = vsel %vm439_vm7, %v436_v24, %v438_v27  ;;  %v289_v29 = vsel %vm286_vm8, %v2082_v22, 0  ;;  %vm443_vm11 = vcmp.ne.s16.totalorder %v438_v27, 0  ;;  %v1788_v27 = vld [vmem:[%s2381_s2 + $0xc] sm:$0xf] }
  0xa3   : > { %vm442_vm10 = vcmp.ne.s16.totalorder %v440_v28, 0  ;;  %364 = vrot.lane.b32.xlu1 %v289_v29, %s1980_s7  ;;  %v288_v30 = vsel %vm285_vm9, %v2079_v19, 0  ;;  %v446_v36 = vsel %vm443_vm11, %v2082_v22, 0  ;;  %v597_v28 = vsel %vm309_vm0, %v2079_v19, 0 }
  0xa4   : > { %362 = vrot.lane.b32.xlu0 %v288_v30, %s1980_s7  ;;  %v514_v31 = vpop.permute.xlu0 %513  ;;  %v445_v33 = vsel %vm442_vm10, %v2079_v19, 0  ;;  %vm366_vm10 = vcmask 138240  }
  0xa5   : > { %v516_v32 = vpop.permute.xlu1 %515 }
  0xa6   : > { %v518_v37 = vsel %vm517_vm12, %v514_v31, %v516_v32  ;;  %vm521_vm15 = vcmp.ne.s16.totalorder %v516_v32, 0 }
  0xa7   : > { %454 = vrot.lane.b32.xlu1 %v445_v33, %s1979_s6  ;;  %vm520_vm1 = vcmp.ne.s16.totalorder %v518_v37, 0  ;;  %v524_v42 = vsel %vm521_vm15, %v2082_v22, 0  ;;  %v1791_v33 = vld [vmem:[%s2381_s2 + $0x10] sm:$0xf]  ;;  %vm1140_vm15 = vcmp.lt.s32.totalorder %v2046_v6, 14 }
  0xa8   : > { %452 = vrot.lane.b32.xlu0 %v1977_v21, %s1979_s6  ;;  %v652_v34 = vpop.permute.xlu0 %651  ;;  %v523_v45 = vsel %vm520_vm1, %v2079_v19, 0  ;;  %vm1141_vm1 = vcmp.lt.s32.totalorder %v2051_v7, 14 }
  0xa9   : > { %v654_v35 = vpop.permute.xlu1 %653  ;;  %vm656_vm3 = vcmp.ne.s16.totalorder %v652_v34, 0 }
  0xaa   : > { %v655_v40 = vsel %vm536_vm13, %v652_v34, %v654_v35  ;;  %v659_v51 = vsel %vm656_vm3, %v2079_v19, 0 }
  0xab   : > { %869 = vrot.lane.b32.xlu1 %v430_v15, %s1980_s7  ;;  %vm657_vm2 = vcmp.ne.s16.totalorder %v655_v40, 0  ;;  %v1785_v15 = vld [vmem:[%s2381_s2 + $0x8] sm:$0xf] }
  0xac   : > { %456 = vrot.lane.b32.xlu0 %v446_v36, %s1979_s6  ;;  %v297_v38 = vpop.permute.xlu0 %296  ;;  %v660_v49 = vsel %vm657_vm2, %v2082_v22, 0  ;;  %vm1146_vm2 = vmpackc.low %vm1141_vm1, %vm1140_vm15  ;;  %s1985_s6 = smov 2  }
  0xad   : > { %v299_v39 = vpop.permute.xlu1 %298 }
  0xae   : > { %v303_v41 = vsel %vm302_vm14, %v297_v38, %v299_v39 }
  0xaf   : > { %530 = vrot.lane.b32.xlu1 %v1977_v21, %s1976_s30  ;;  %v311_v44 = vsel %vm309_vm0, %v303_v41, 0 }
  0xb0   : > { %871 = vrot.lane.b32.xlu0 %v434_v17, %s1980_s7  ;;  %v301_v43 = vpop.permute.xlu0 %300  ;;  %s1986_s7 = smov 32  }
  0xb1   : > { %v304_v46 = vsel %vm302_vm14, %v299_v39, %v301_v43  ;;  %v728_v47 = vpop.permute.xlu1 %727  ;;  %v1794_v39 = vld [vmem:[%s2381_s2 + $0x14] sm:$0xf]  ;;  %v1797_v43 = vld [vmem:[%s2381_s2 + $0x18] sm:$0xf] }
  0xb2   : > { %1781 = vmatprep.subr.msk.bf16.mxu0 %vm309_vm0, %v304_v46  ;;  %vm732_vm8 = vcmp.ne.s16.totalorder %v728_v47, 0 }
  0xb3   : > { %534 = vrot.lane.b32.xlu1 %v524_v42, %s1976_s30  ;;  %317 = vmatpush1.bf16.msra.mxu0 %v311_v44  ;;  %v735_v53 = vsel %vm732_vm8, %v2079_v19, 0  ;;  %vm1005_vm8 = vcmask 769024  }
  0xb4   : > { %532 = vrot.lane.b32.xlu0 %v523_v45, %s1976_s30  ;;  %v730_v50 = vpop.permute.xlu0 %729  ;;  %v1800_v45 = vld [vmem:[%s2381_s2 + $0x1c] sm:$0xf]  ;;  %s1983_s30 = smov 98  }
  0xb5   : > { %v731_v52 = vsel %vm458_vm5, %v728_v47, %v730_v50  ;;  %v361_v55 = vpop.permute.xlu1 %360 }
  0xb6   : > { %1782 = vmatmul.mubr.msk.bf16.vlgmr.msra.gmra.mrb[0].mxu0 %vm305_vm4, %v1780_v48  ;;  %vm733_vm9 = vcmp.ne.s16.totalorder %v731_v52, 0  ;;  %v1803_v52 = vld [vmem:[%s2381_s2 + $0x20] sm:$0xf] }
  0xb7   : > { %669 = vrot.lane.b32.xlu1 %v660_v49, %s1975_s29  ;;  %410 = vmatprep.mubr.bf16.mxu0 %v1972_v2  ;;  %v736_v54 = vsel %vm733_vm9, %v2082_v22, 0 }
  0xb8   : > { %667 = vrot.lane.b32.xlu0 %v659_v51, %s1975_s29 }
  0xbb   : > { %743 = vrot.lane.b32.xlu1 %v735_v53, %s1974_s28 }
  0xbc   : > { %671 = vrot.lane.b32.xlu0 %v1977_v21, %s1975_s29  ;;  %s1982_s29 = smov 94  }
  0xbf   : > { %747 = vrot.lane.b32.xlu1 %v1977_v21, %s1974_s28 }
  0xc0   : > { %745 = vrot.lane.b32.xlu0 %v736_v54, %s1974_s28 }
  0xc3   : > { %810 = vrot.lane.b32.xlu1 %v2082_v22, %s1981_s10 }
  0xc4   : > { %808 = vrot.lane.b32.xlu0 %v2079_v19, %s1981_s10 }
  0xc8   : > { %812 = vrot.lane.b32.xlu0 %v1977_v21, %s1981_s10 }
 0x115   : > { %v365_v56 = vpop.permute.xlu1 %364 }
 0x116   : > { %v363_v57 = vpop.permute.xlu0 %362 }
 0x117   : > { %v367_v58 = vsel %vm366_vm10, %v361_v55, %v363_v57  ;;  %v368_v59 = vsel %vm366_vm10, %v363_v57, %v365_v56 }
 0x118   : > { %v373_v60 = vsel %vm309_vm0, %v367_v58, 0  ;;  %1783 = vmatprep.subr.msk.bf16.mxu0 %vm309_vm0, %v368_v59 }
 0x119   : > { %379 = vmatpush1.bf16.msra.mxu0 %v373_v60  ;;  %v455_v61 = vpop.permute.xlu1 %454 }
 0x11a   : > { %v453_v63 = vpop.permute.xlu0 %452 }
 0x11b   : > { %v459_v0 = vsel %vm458_vm5, %v453_v63, %v455_v61  ;;  %v1147_v63 = vsel %vm1146_vm2, 65537, %v1972_v2 }
 0x11c   : > { %1784 = vmatmul.mubr.msk.bf16.vlgmr.msra.gmra.mrb[0].mxu0 %vm305_vm4, %v290_v62  ;;  %v465_v9 = vsel %vm309_vm0, %v459_v0, 0 }
 0x11d   : > { %v870_v1 = vpop.permute.xlu1 %869  ;;  %502 = vmatprep.mubr.bf16.mxu0 %v1972_v2 }
 0x11e   : > { %v457_v3 = vpop.permute.xlu0 %456  ;;  %vm874_vm11 = vcmp.ne.s16.totalorder %v870_v1, 0 }
 0x11f   : > { %v460_v4 = vsel %vm458_vm5, %v455_v61, %v457_v3  ;;  %v877_v5 = vsel %vm874_vm11, %v2079_v19, 0 }
 0x120   : > { %1786 = vmatprep.subr.msk.bf16.mxu0 %vm309_vm0, %v460_v4  ;;  %885 = vrot.lane.b32.xlu1 %v877_v5, %s1973_s27 }
 0x121   : > { %471 = vmatpush1.bf16.msra.mxu0 %v465_v9  ;;  %v531_v11 = vpop.permute.xlu1 %530 }
 0x122   : > { %v872_v12 = vpop.permute.xlu0 %871 }
 0x123   : > { %v873_v13 = vsel %vm366_vm10, %v870_v1, %v872_v12  ;;  %v2223_v1 = vrot.slane %v1147_v63, %v2063_v10  ;;  %vm1160_vm10 = vcmask 801792  }
 0x124   : > { %vm875_vm14 = vcmp.ne.s16.totalorder %v873_v13, 0  ;;  %889 = vrot.lane.b32.xlu1 %v1977_v21, %s1973_s27 }
 0x125   : > { %v878_v14 = vsel %vm875_vm14, %v2082_v22, 0  ;;  %v535_v16 = vpop.permute.xlu1 %534 }
 0x126   : > { %887 = vrot.lane.b32.xlu0 %v878_v14, %s1973_s27  ;;  %v533_v17 = vpop.permute.xlu0 %532  ;;  %v966_v14 = vstv %s963_s8 }
 0x127   : > { %v537_v18 = vsel %vm536_vm13, %v531_v11, %v533_v17  ;;  %v538_v20 = vsel %vm536_vm13, %v533_v17, %v535_v16 }
 0x128   : > { %1787 = vmatmul.mubr.msk.bf16.vlgmr.msra.gmra.mrb[0].mxu0 %vm305_vm4, %v1785_v15  ;;  %v543_v23 = vsel %vm309_vm0, %v537_v18, 0  ;;  %1789 = vmatprep.subr.msk.bf16.mxu0 %vm309_vm0, %v538_v20 }
 0x129   : > { %549 = vmatpush1.bf16.msra.mxu0 %v543_v23  ;;  %580 = vmatprep.mubr.bf16.mxu0 %v1972_v2  ;;  %v670_v26 = vpop.permute.xlu1 %669 }
 0x12a   : > { %1792 = vmatprep.subr.msk.bf16.mxu0 %vm309_vm0, %v2082_v22  ;;  %v668_v24 = vpop.permute.xlu0 %667 }
 0x12b   : > { %v673_v30 = vsel %vm517_vm12, %v668_v24, %v670_v26 }
 0x12c   : > { %v679_v19 = vsel %vm309_vm0, %v673_v30, 0 }
 0x12d   : > { %v744_v22 = vpop.permute.xlu1 %743 }
 0x12e   : > { %v672_v25 = vpop.permute.xlu0 %671 }
 0x12f   : > { %v674_v29 = vsel %vm517_vm12, %v670_v26, %v672_v25  ;;  %vm814_vm12 = vcmask 916480  }
 0x131   : > { %v748_v32 = vpop.permute.xlu1 %747 }
 0x132   : > { %v746_v31 = vpop.permute.xlu0 %745 }
 0x133   : > { %v750_v34 = vsel %vm439_vm7, %v746_v31, %v748_v32  ;;  %v749_v36 = vsel %vm439_vm7, %v744_v22, %v746_v31  ;;  %vm986_vm7 = vcmp.ge.s32.totalorder %v2051_v7, 2 }
 0x134   : > { %1790 = vmatmul.mubr.msk.bf16.vlgmr.msra.gmra.mrb[0].mxu0 %vm305_vm4, %v1788_v27  ;;  %v755_v40 = vsel %vm309_vm0, %v749_v36, 0 }
 0x135   : > { %603 = vmatpush1.bf16.msra.mxu0 %v597_v28  ;;  %634 = vmatprep.mubr.bf16.mxu0 %v1972_v2  ;;  %v811_v38 = vpop.permute.xlu1 %810 }
 0x136   : > { %1795 = vmatprep.subr.msk.bf16.mxu0 %vm309_vm0, %v674_v29  ;;  %v809_v35 = vpop.permute.xlu0 %808 }
 0x137   : > { %v815_v42 = vsel %vm814_vm12, %v809_v35, %v811_v38 }
 0x138   : > { %v821_v44 = vsel %vm309_vm0, %v815_v42, 0 }
 0x13a   : > { %v813_v37 = vpop.permute.xlu0 %812 }
 0x13b   : > { %v816_v41 = vsel %vm814_vm12, %v811_v38, %v813_v37 }
 0x140   : > { %1793 = vmatmul.mubr.msk.bf16.vlgmr.msra.gmra.mrb[0].mxu0 %vm305_vm4, %v1791_v33 }
 0x141   : > { %685 = vmatpush1.bf16.msra.mxu0 %v679_v19  ;;  %716 = vmatprep.mubr.bf16.mxu0 %v1972_v2 }
 0x142   : > { %1798 = vmatprep.subr.msk.bf16.mxu0 %vm309_vm0, %v750_v34 }
 0x14c   : > { %1796 = vmatmul.mubr.msk.bf16.vlgmr.msra.gmra.mrb[0].mxu0 %vm305_vm4, %v1794_v39 }
 0x14d   : > { %761 = vmatpush1.bf16.msra.mxu0 %v755_v40  ;;  %792 = vmatprep.mubr.bf16.mxu0 %v1972_v2 }
 0x14e   : > { %1801 = vmatprep.subr.msk.bf16.mxu0 %vm309_vm0, %v816_v41 }
 0x158   : > { %1799 = vmatmul.mubr.msk.bf16.vlgmr.msra.gmra.mrb[0].mxu0 %vm305_vm4, %v1797_v43 }
 0x159   : > { %827 = vmatpush1.bf16.msra.mxu0 %v821_v44  ;;  %858 = vmatprep.mubr.bf16.mxu0 %v1972_v2 }
 0x164   : > { %1802 = vmatmul.mubr.msk.bf16.vlgmr.msra.gmra.mrb[0].mxu0 %vm305_vm4, %v1800_v45 }
 0x165   : > { %934 = vmatprep.mubr.bf16.mxu0 %v1972_v2 }
 0x192   : > { %v886_v46 = vpop.permute.xlu1 %885 }
 0x196   : > { %v890_v47 = vpop.permute.xlu1 %889 }
 0x198   : > { %v888_v48 = vpop.permute.xlu0 %887 }
 0x199   : > { %v891_v49 = vsel %vm282_vm6, %v886_v46, %v888_v48  ;;  %v892_v50 = vsel %vm282_vm6, %v888_v48, %v890_v47  ;;  %vm985_vm6 = vcmp.ge.s32.totalorder %v2046_v6, 2  ;;  %v2227_v6 = vrot.slane %v1147_v63, %v2055_v8 }
 0x19a   : > { %v897_v51 = vsel %vm309_vm0, %v891_v49, 0  ;;  %1804 = vmatprep.subr.msk.bf16.mxu0 %vm309_vm0, %v892_v50  ;;  %vm991_vm13 = vmpackc.low %vm986_vm7, %vm985_vm6  ;;  %vm1238_vm6 = vcmask 1031168  }
 0x19b   : > { %903 = vmatpush1.bf16.msra.mxu0 %v897_v51  ;;  %v992_v61 = vsel %vm991_vm13, 65537, %v1972_v2  ;;  %vm1257_vm13 = vcmask 15360  }
 0x19c   : > { %v1000_v62 = vrot.slane %v992_v61, %v2063_v10  ;;  %v996_v0 = vrot.slane %v992_v61, %v2055_v8 }
 0x19e   : > { %1805 = vmatmul.mubr.msk.bf16.vlgmr.msra.gmra.mrb[0].mxu0 %vm305_vm4, %v1803_v52 }
 0x271   : > { %v936_v53 = vpop.f32.mrb[0].mxu0 }
 0x272   : > { %v938_v54 = vpop.f32.mrb[1].mxu0  ;;  %v949_v55 = vmul.f32 %v936_v53, %v936_v53 }
 0x273   : > { %v940_v56 = vpop.f32.mrb[2].mxu0  ;;  %v945_v57 = vadd.f32 %v938_v54, %v936_v53  ;;  %v950_v58 = vmul.f32 %v938_v54, %v938_v54 }
 0x274   : > { %v941_v59 = vpop.f32.mrb[3].mxu0 }
 0x275   : > { %946 = vadd.xlane.f32.xlu0 %v945_v57  ;;  %v951_v60 = vadd.f32 %v950_v58, %v949_v55 }
 0x277   : > { %952 = vadd.xlane.f32.xlu1 %v951_v60 }
 0x288   : > { %1003 = vrot.lane.b32.xlu1 %v1000_v62, %s1982_s29 }
 0x28b   : > { %1001 = vrot.lane.b32.xlu0 %v996_v0, %s1982_s29 }
 0x28c   : > { %1158 = vrot.lane.b32.xlu1 %v2223_v1, %s1983_s30 }
 0x28f   : > { %1156 = vrot.lane.b32.xlu0 %v2227_v6, %s1983_s30 }
 0x290   : > { %1236 = vrot.lane.b32.xlu1 %v1000_v62, %s1984_s5 }
 0x293   : > { %1234 = vrot.lane.b32.xlu0 %v996_v0, %s1984_s5 }
 0x294   : > { %1374 = vrot.lane.b32.xlu1 %v2223_v1, %s1985_s6 }
 0x297   : > { %1372 = vrot.lane.b32.xlu0 %v2227_v6, %s1985_s6 }
 0x29b   : > { %1019 = vrot.lane.b32.xlu0 %v1977_v21, %s1986_s7 }
 0x302   : > { %v947_v7 = vpop.xlane.xlu0 %946 }
 0x303   : > { %v948_v8 = vmul.f32 0.00390625, %v947_v7  ;;  %v1013_v7 = vld [vmem:[%s2382_s3] sm:$0xf] }
 0x304   : > { %v953_v10 = vpop.xlane.xlu1 %952 }
 0x305   : > { %v954_v3 = vmul.f32 0.00390625, %v953_v10  ;;  %v955_v4 = vmul.f32 %v948_v8, %v948_v8  ;;  %v957_v11 = vsub.f32 %v936_v53, %v948_v8  ;;  %v958_v12 = vsub.f32 %v938_v54, %v948_v8  ;;  %v1806_v54 = vld [vmem:[%s2382_s3 + $0x4] sm:$0xf] }
 0x306   : > { %v1002_v22 = vpop.permute.xlu0 %1001 }
 0x307   : > { %v956_v5 = vsub.f32 %v954_v3, %v955_v4 }
 0x308   : > { %v1004_v30 = vpop.permute.xlu1 %1003 }
 0x309   : > { %v959_v9 = vadd.f32 1e-05, %v956_v5  ;;  %v1006_v31 = vsel %vm1005_vm8, %v1002_v22, %v1004_v30  ;;  %vm1009_vm11 = vcmp.ne.s16.totalorder %v1004_v30, 0 }
 0x30a   : > { %vm1008_vm9 = vcmp.ne.s16.totalorder %v1006_v31, 0  ;;  %v1157_v32 = vpop.permute.xlu0 %1156  ;;  %v1817_v31 = vld [vmem:[%s2382_s3 + $0x10] sm:$0xf] }
 0x30b   : > { %1939 = vrsqrt.f32 %v959_v9 }
 0x30c   : > { %v1159_v19 = vpop.permute.xlu1 %1158 }
 0x30d   : > { %v1161_v34 = vsel %vm1160_vm10, %v1157_v32, %v1159_v19  ;;  %vm1164_vm14 = vcmp.ne.s16.totalorder %v1159_v19, 0 }
 0x30e   : > { %vm1163_vm12 = vcmp.ne.s16.totalorder %v1161_v34, 0  ;;  %v1235_v36 = vpop.permute.xlu0 %1234 }
 0x310   : > { %v1237_v39 = vpop.permute.xlu1 %1236 }
 0x311   : > { %v1239_v40 = vsel %vm1238_vm6, %v1235_v36, %v1237_v39  ;;  %vm1242_vm15 = vcmp.ne.s16.totalorder %v1237_v39, 0  ;;  %v1823_v39 = vld [vmem:[%s2382_s3 + $0x18] sm:$0xf] }
 0x312   : > { %vm1241_vm7 = vcmp.ne.s16.totalorder %v1239_v40, 0  ;;  %v1373_v41 = vpop.permute.xlu0 %1372 }
 0x313   : > { %vm1377_vm1 = vcmp.ne.s16.totalorder %v1373_v41, 0 }
 0x314   : > { %v1375_v42 = vpop.permute.xlu1 %1374 }
 0x315   : > { %v1940_v13 = vpop.eup %1939  ;;  %v1376_v44 = vsel %vm1257_vm13, %v1373_v41, %v1375_v42 }
 0x316   : > { %v961_v15 = vmul.f32 %v1940_v13, %v957_v11  ;;  %v962_v16 = vmul.f32 %v1940_v13, %v958_v12  ;;  %vm1378_vm2 = vcmp.ne.s16.totalorder %v1376_v44, 0  ;;  %v1020_v48 = vpop.permute.xlu0 %1019 }
 0x318   : > { %vm964_vm3 = vcmp.gt.f32.partialorder %v961_v15, 0.0  ;;  %vm965_vm5 = vcmp.gt.f32.partialorder %v962_v16, 0.0  ;;  %v967_v17 = vmul.f32 %v966_v14, %v961_v15  ;;  %v968_v18 = vmul.f32 %v966_v14, %v962_v16 }
 0x31a   : > { %v969_v20 = vsel %vm964_vm3, %v961_v15, %v967_v17  ;;  %v970_v23 = vsel %vm965_vm5, %v962_v16, %v968_v18  ;;  %vm1025_vm3 = vcmask 261120   ;;  %vm1179_vm5 = vcmask 244736   ;;  %v1811_v18 = vld [vmem:[%s2382_s3 + $0x8] sm:$0xf] }
 0x31b   : > { %v973_v24 = vrot.slane %v969_v20, 4  ;;  %v974_v25 = vrot.slane %v970_v23, 4 }
 0x31d   : > { %977 = vst [vmem:[#allocation2 + $0x8] sm:$0xf0] %v973_v24  ;;  %978 = vst [vmem:[#allocation2 + $0x10] sm:$0xf0] %v974_v25  ;;  %v1814_v25 = vld [vmem:[%s2382_s3 + $0xc] sm:$0xf] }
 0x324   : > { %v1694_v26 = vld [vmem:[#allocation2 + $0x8] sm:$0xff]  ;;  %v1695_v27 = vld [vmem:[#allocation2 + $0x10] sm:$0xff] }
 0x325   : > { %1698 = vst [vmem:[%s2245_s12] sm:$0xff] %v1694_v26  ;;  %1699 = vst [vmem:[%s2245_s12 + $0x8] sm:$0xff] %v1695_v27  ;;  %v2249_v28 = vpack.c.bf16 %v1695_v27, %v1695_v27  ;;  %v2251_v29 = vpack.c.bf16 %v1694_v26, %v1694_v26 }
 0x327   : > { %1023 = vrot.lane.b32.xlu0 %v2249_v28, %s1986_s7  ;;  %1021 = vrot.lane.b32.xlu1 %v2251_v29, %s1986_s7  ;;  %v1011_v33 = vsel %vm1008_vm9, %v2251_v29, 0  ;;  %v1012_v35 = vsel %vm1009_vm11, %v2249_v28, 0  ;;  %v1167_v37 = vsel %vm1164_vm14, %v2249_v28, 0  ;;  %v1166_v38 = vsel %vm1163_vm12, %v2251_v29, 0 }
 0x328   : > { %v1244_v43 = vsel %vm1241_vm7, %v2251_v29, 0  ;;  %v1245_v45 = vsel %vm1242_vm15, %v2249_v28, 0  ;;  %v1380_v46 = vsel %vm1377_vm1, %v2251_v29, 0  ;;  %v1381_v47 = vsel %vm1378_vm2, %v2249_v28, 0 }
 0x329   : > { %vm1087_vm14 = vcmask 277504   ;;  %v1318_v22 = vsel %vm309_vm0, %v2251_v29, 0 }
 0x32b   : > { %1450 = vrot.lane.b32.xlu0 %v1000_v62, %s1987_s16  ;;  %1448 = vrot.lane.b32.xlu1 %v996_v0, %s1987_s16 }
 0x32f   : > { %1081 = vrot.lane.b32.xlu1 %v1977_v21, %s1988_s13  ;;  %1083 = vrot.lane.b32.xlu0 %v1011_v33, %s1988_s13 }
 0x333   : > { %1085 = vrot.lane.b32.xlu1 %v1012_v35, %s1988_s13  ;;  %1173 = vrot.lane.b32.xlu0 %v1977_v21, %s1987_s16 }
 0x337   : > { %1177 = vrot.lane.b32.xlu0 %v1167_v37, %s1987_s16  ;;  %1175 = vrot.lane.b32.xlu1 %v1166_v38, %s1987_s16 }
 0x33b   : > { %1592 = vrot.lane.b32.xlu0 %v2223_v1, %s1988_s13  ;;  %1590 = vrot.lane.b32.xlu1 %v2227_v6, %s1988_s13 }
 0x33f   : > { %1251 = vrot.lane.b32.xlu1 %v1977_v21, %s1985_s6  ;;  %1253 = vrot.lane.b32.xlu0 %v1244_v43, %s1985_s6 }
 0x343   : > { %1255 = vrot.lane.b32.xlu1 %v1245_v45, %s1985_s6  ;;  %1388 = vrot.lane.b32.xlu0 %v1380_v46, %s1984_s5 }
 0x347   : > { %1392 = vrot.lane.b32.xlu0 %v1977_v21, %s1984_s5  ;;  %1390 = vrot.lane.b32.xlu1 %v1381_v47, %s1984_s5 }
 0x399   : > { %v1022_v49 = vpop.permute.xlu1 %1021  ;;  %v1024_v50 = vpop.permute.xlu0 %1023 }
 0x39a   : > { %v1027_v51 = vsel %vm1025_vm3, %v1022_v49, %v1024_v50  ;;  %v1026_v52 = vsel %vm1025_vm3, %v1020_v48, %v1022_v49  ;;  %v1826_v48 = vld [vmem:[%s2382_s3 + $0x1c] sm:$0xf] }
 0x39b   : > { %1807 = vmatprep.subr.msk.bf16.mxu1 %vm309_vm0, %v1027_v51  ;;  %v1032_v53 = vsel %vm309_vm0, %v1026_v52, 0  ;;  %v1829_v52 = vld [vmem:[%s2382_s3 + $0x20] sm:$0xf] }
 0x39c   : > { %1038 = vmatpush1.bf16.msra.mxu1 %v1032_v53 }
 0x39d   : > { %v1449_v55 = vpop.permute.xlu1 %1448  ;;  %v1451_v56 = vpop.permute.xlu0 %1450 }
 0x39e   : > { %vm1453_vm9 = vcmp.ne.s16.totalorder %v1449_v55, 0  ;;  %v1452_v57 = vsel %vm1179_vm5, %v1449_v55, %v1451_v56 }
 0x39f   : > { %vm1454_vm11 = vcmp.ne.s16.totalorder %v1452_v57, 0  ;;  %1808 = vmatmul.mubr.msk.bf16.vlgmr.msra.gmra.mrb[0].mxu1 %vm305_vm4, %v1806_v54  ;;  %v1456_v58 = vsel %vm1453_vm9, %v2251_v29, 0 }
 0x3a0   : > { %1464 = vrot.lane.b32.xlu1 %v1456_v58, %s1983_s30  ;;  %v1457_v59 = vsel %vm1454_vm11, %v2249_v28, 0  ;;  %1131 = vmatprep.mubr.bf16.mxu1 %v1972_v2 }
 0x3a1   : > { %v1082_v60 = vpop.permute.xlu1 %1081  ;;  %1466 = vrot.lane.b32.xlu0 %v1457_v59, %s1983_s30  ;;  %v1084_v61 = vpop.permute.xlu0 %1083 }
 0x3a2   : > { %v1088_v62 = vsel %vm1087_vm14, %v1082_v60, %v1084_v61 }
 0x3a3   : > { %v1094_v6 = vsel %vm309_vm0, %v1088_v62, 0 }
 0x3a4   : > { %1468 = vrot.lane.b32.xlu1 %v1977_v21, %s1983_s30 }
 0x3a5   : > { %v1086_v63 = vpop.permute.xlu1 %1085  ;;  %1529 = vrot.lane.b32.xlu0 %v2251_v29, %s1989_s18  ;;  %v1174_v0 = vpop.permute.xlu0 %1173 }
 0x3a6   : > { %v1089_v1 = vsel %vm1087_vm14, %v1084_v61, %v1086_v63 }
 0x3a7   : > { %1809 = vmatprep.subr.msk.bf16.mxu1 %vm309_vm0, %v1089_v1 }
 0x3a8   : > { %1531 = vrot.lane.b32.xlu1 %v2249_v28, %s1989_s18  ;;  %1100 = vmatpush1.bf16.msra.mxu1 %v1094_v6 }
 0x3a9   : > { %v1176_v8 = vpop.permute.xlu1 %1175  ;;  %1533 = vrot.lane.b32.xlu0 %v1977_v21, %s1989_s18  ;;  %v1178_v10 = vpop.permute.xlu0 %1177 }
 0x3aa   : > { %v1180_v3 = vsel %vm1179_vm5, %v1174_v0, %v1176_v8  ;;  %v1181_v4 = vsel %vm1179_vm5, %v1176_v8, %v1178_v10 }
 0x3ab   : > { %v1186_v5 = vsel %vm309_vm0, %v1180_v3, 0  ;;  %1810 = vmatmul.mubr.msk.bf16.vlgmr.msra.gmra.mrb[0].mxu1 %vm305_vm4, %v1013_v7  ;;  %1812 = vmatprep.subr.msk.bf16.mxu1 %vm309_vm0, %v1181_v4  ;;  %v1687_v3 = vstv %s1832_s9 }
 0x3ac   : > { %1192 = vmatpush1.bf16.msra.mxu1 %v1186_v5  ;;  %1223 = vmatprep.mubr.bf16.mxu1 %v1972_v2 }
 0x3ad   : > { %v1591_v9 = vpop.permute.xlu1 %1590  ;;  %v1593_v11 = vpop.permute.xlu0 %1592 }
 0x3ae   : > { %vm1595_vm12 = vcmp.ne.s16.totalorder %v1591_v9, 0  ;;  %v1594_v12 = vsel %vm1087_vm14, %v1591_v9, %v1593_v11 }
 0x3af   : > { %vm1596_vm7 = vcmp.ne.s16.totalorder %v1594_v12, 0  ;;  %v1598_v13 = vsel %vm1595_vm12, %v2251_v29, 0  ;;  %v1820_v29 = vld [vmem:[%s2382_s3 + $0x14] sm:$0xf] }
 0x3b0   : > { %1606 = vrot.lane.b32.xlu1 %v1598_v13, %s1982_s29  ;;  %v1599_v14 = vsel %vm1596_vm7, %v2249_v28, 0 }
 0x3b1   : > { %v1252_v15 = vpop.permute.xlu1 %1251  ;;  %1608 = vrot.lane.b32.xlu0 %v1599_v14, %s1982_s29  ;;  %v1254_v16 = vpop.permute.xlu0 %1253 }
 0x3b2   : > { %v1258_v17 = vsel %vm1257_vm13, %v1252_v15, %v1254_v16 }
 0x3b3   : > { %v1264_v24 = vsel %vm309_vm0, %v1258_v17, 0 }
 0x3b4   : > { %1610 = vrot.lane.b32.xlu1 %v1977_v21, %s1982_s29 }
 0x3b5   : > { %v1256_v20 = vpop.permute.xlu1 %1255  ;;  %v1389_v21 = vpop.permute.xlu0 %1388 }
 0x3b6   : > { %v1259_v23 = vsel %vm1257_vm13, %v1254_v16, %v1256_v20 }
 0x3b7   : > { %1813 = vmatmul.mubr.msk.bf16.vlgmr.msra.gmra.mrb[0].mxu1 %vm305_vm4, %v1811_v18  ;;  %1815 = vmatprep.subr.msk.bf16.mxu1 %vm309_vm0, %v1259_v23 }
 0x3b8   : > { %1270 = vmatpush1.bf16.msra.mxu1 %v1264_v24  ;;  %1301 = vmatprep.mubr.bf16.mxu1 %v1972_v2 }
 0x3b9   : > { %1818 = vmatprep.subr.msk.bf16.mxu1 %vm309_vm0, %v2249_v28  ;;  %v1391_v26 = vpop.permute.xlu1 %1390  ;;  %v1393_v27 = vpop.permute.xlu0 %1392 }
 0x3ba   : > { %v1395_v30 = vsel %vm1238_vm6, %v1391_v26, %v1393_v27  ;;  %v1394_v28 = vsel %vm1238_vm6, %v1389_v21, %v1391_v26  ;;  %vm1535_vm6 = vcmask 785408  }
 0x3bb   : > { %v1400_v32 = vsel %vm309_vm0, %v1394_v28, 0 }
 0x3c3   : > { %1816 = vmatmul.mubr.msk.bf16.vlgmr.msra.gmra.mrb[0].mxu1 %vm305_vm4, %v1814_v25 }
 0x3c4   : > { %1324 = vmatpush1.bf16.msra.mxu1 %v1318_v22  ;;  %1355 = vmatprep.mubr.bf16.mxu1 %v1972_v2 }
 0x3c5   : > { %1821 = vmatprep.subr.msk.bf16.mxu1 %vm309_vm0, %v1395_v30 }
 0x3cf   : > { %1819 = vmatmul.mubr.msk.bf16.vlgmr.msra.gmra.mrb[0].mxu1 %vm305_vm4, %v1817_v31 }
 0x3d0   : > { %1406 = vmatpush1.bf16.msra.mxu1 %v1400_v32  ;;  %1437 = vmatprep.mubr.bf16.mxu1 %v1972_v2 }
 0x3db   : > { %1822 = vmatmul.mubr.msk.bf16.vlgmr.msra.gmra.mrb[0].mxu1 %vm305_vm4, %v1820_v29 }
 0x3dc   : > { %1513 = vmatprep.mubr.bf16.mxu1 %v1972_v2 }
 0x412   : > { %v1465_v33 = vpop.permute.xlu1 %1464 }
 0x413   : > { %v1467_v19 = vpop.permute.xlu0 %1466 }
 0x414   : > { %v1470_v34 = vsel %vm1160_vm10, %v1465_v33, %v1467_v19 }
 0x415   : > { %v1476_v38 = vsel %vm309_vm0, %v1470_v34, 0 }
 0x416   : > { %v1469_v35 = vpop.permute.xlu1 %1468 }
 0x417   : > { %v1471_v36 = vsel %vm1160_vm10, %v1467_v19, %v1469_v35  ;;  %v1530_v37 = vpop.permute.xlu0 %1529 }
 0x418   : > { %1824 = vmatprep.subr.msk.bf16.mxu1 %vm309_vm0, %v1471_v36 }
 0x419   : > { %1482 = vmatpush1.bf16.msra.mxu1 %v1476_v38 }
 0x41a   : > { %v1532_v40 = vpop.permute.xlu1 %1531 }
 0x41b   : > { %v1536_v41 = vsel %vm1535_vm6, %v1530_v37, %v1532_v40  ;;  %v1534_v42 = vpop.permute.xlu0 %1533 }
 0x41c   : > { %v1542_v43 = vsel %vm309_vm0, %v1536_v41, 0  ;;  %v1537_v44 = vsel %vm1535_vm6, %v1532_v40, %v1534_v42  ;;  %1825 = vmatmul.mubr.msk.bf16.vlgmr.msra.gmra.mrb[0].mxu1 %vm305_vm4, %v1823_v39 }
 0x41d   : > { %1827 = vmatprep.subr.msk.bf16.mxu1 %vm309_vm0, %v1537_v44  ;;  %1579 = vmatprep.mubr.bf16.mxu1 %v1972_v2 }
 0x41e   : > { %1548 = vmatpush1.bf16.msra.mxu1 %v1542_v43 }
 0x422   : > { %v1607_v45 = vpop.permute.xlu1 %1606 }
 0x423   : > { %v1609_v46 = vpop.permute.xlu0 %1608 }
 0x424   : > { %v1612_v47 = vsel %vm1005_vm8, %v1607_v45, %v1609_v46 }
 0x425   : > { %v1618_v51 = vsel %vm309_vm0, %v1612_v47, 0 }
 0x426   : > { %v1611_v49 = vpop.permute.xlu1 %1610 }
 0x427   : > { %v1613_v50 = vsel %vm1005_vm8, %v1609_v46, %v1611_v49 }
 0x428   : > { %1828 = vmatmul.mubr.msk.bf16.vlgmr.msra.gmra.mrb[0].mxu1 %vm305_vm4, %v1826_v48  ;;  %1830 = vmatprep.subr.msk.bf16.mxu1 %vm309_vm0, %v1613_v50 }
 0x429   : > { %1624 = vmatpush1.bf16.msra.mxu1 %v1618_v51  ;;  %1655 = vmatprep.mubr.bf16.mxu1 %v1972_v2 }
 0x434   : > { %1831 = vmatmul.mubr.msk.bf16.vlgmr.msra.gmra.mrb[0].mxu1 %vm305_vm4, %v1829_v52 }
 0x507   : > { %v1657_v53 = vpop.f32.mrb[0].mxu1 }
 0x508   : > { %v1659_v54 = vpop.f32.mrb[1].mxu1  ;;  %v1670_v55 = vmul.f32 %v1657_v53, %v1657_v53 }
 0x509   : > { %v1661_v56 = vpop.f32.mrb[2].mxu1  ;;  %v1666_v57 = vadd.f32 %v1659_v54, %v1657_v53  ;;  %v1671_v58 = vmul.f32 %v1659_v54, %v1659_v54 }
 0x50a   : > { %v1662_v59 = vpop.f32.mrb[3].mxu1 }
 0x50b   : > { %1667 = vadd.xlane.f32.xlu0 %v1666_v57  ;;  %v1672_v60 = vadd.f32 %v1671_v58, %v1670_v55 }
 0x50d   : > { %1673 = vadd.xlane.f32.xlu1 %v1672_v60 }
 0x598   : > { %v1668_v61 = vpop.xlane.xlu0 %1667 }
 0x599   : > { %v1669_v62 = vmul.f32 0.00390625, %v1668_v61 }
 0x59a   : > { %v1674_v63 = vpop.xlane.xlu1 %1673 }
 0x59b   : > { %v1675_v2 = vmul.f32 0.00390625, %v1674_v63  ;;  %v1676_v0 = vmul.f32 %v1669_v62, %v1669_v62  ;;  %v1678_v7 = vsub.f32 %v1657_v53, %v1669_v62  ;;  %v1679_v8 = vsub.f32 %v1659_v54, %v1669_v62 }
 0x59d   : > { %v1677_v1 = vsub.f32 %v1675_v2, %v1676_v0 }
 0x59f   : > { %v1680_v6 = vadd.f32 1e-05, %v1677_v1 }
 0x5a1   : > { %1941 = vrsqrt.f32 %v1680_v6 }
 0x5ab   : > { %v1942_v10 = vpop.eup %1941 }
 0x5ac   : > { %v1682_v4 = vmul.f32 %v1942_v10, %v1678_v7  ;;  %v1683_v5 = vmul.f32 %v1942_v10, %v1679_v8 }
 0x5ae   : > { %vm1685_vm0 = vcmp.gt.f32.partialorder %v1682_v4, 0.0  ;;  %vm1686_vm4 = vcmp.gt.f32.partialorder %v1683_v5, 0.0  ;;  %v1688_v9 = vmul.f32 %v1687_v3, %v1682_v4  ;;  %v1689_v11 = vmul.f32 %v1687_v3, %v1683_v5 }
 0x5b0   : > { %v1690_v12 = vsel %vm1685_vm0, %v1682_v4, %v1688_v9  ;;  %v1691_v13 = vsel %vm1686_vm4, %v1683_v5, %v1689_v11 }
 0x5b1   : > { %1692 = vst [vmem:[#allocation2 + $0x28] sm:$0xf] %v1690_v12  ;;  %1693 = vst [vmem:[#allocation2 + $0x30] sm:$0xf] %v1691_v13 }
 0x5b8   : > { %v1696_v14 = vld [vmem:[#allocation2 + $0x28] sm:$0xf]  ;;  %v1697_v15 = vld [vmem:[#allocation2 + $0x30] sm:$0xf] }
 0x5b9   : > { %1700 = vst [vmem:[%s2245_s12 + $0x10] sm:$0xf] %v1696_v14  ;;  %1701 = vst [vmem:[%s2245_s12 + $0x18] sm:$0xf] %v1697_v15 }
 0x5ba PF: > { %s15_s15 = sadd.s32 1, %s1968_s15  }
 0x5bb   : > { %p12_p1 = scmp.ge.s32.totalorder %s15_s15, 4  }
 0x5bd   :  { %14 = sbr.rel (!%p12_p1) target bundleno = 1 (0x1), region = 87 }
 0x5c4   :  { %1723 = vsyncpa [#allocation4], 1 }
 0x5c5   :  { %1725 = vsyncpa [#allocation4 + $0x1], 1 }

</bundles_post_ra>
